<compile_context>
chip_gen: v7x
topology: tpu7x:2x2x1
jax: 0.10.0
libtpu: 0.0.40
codegen_flags: <defaults>
</compile_context>

<pallas_src>
import numpy as np
import jax
import jax.numpy as jnp
from jax import lax
from jax.experimental import pallas as pl
from jax.experimental.pallas import tpu as pltpu

BN_EPS = 1e-5


def _ground_head_kernel(counts_ref, x_full_ref, x_slice_ref, wf_ref, bf_ref,
                        vis_ref, att_ref, retx_ref):
    """mean-pool -> fused(Linear+BN+Linear) [bf16 weight, f32 acc]
       -> per-clip box pad + attention mask (counts read from SMEM)."""
    _, B, max_pad = att_ref.shape

    # (1) Temporal mean pooling: inputs.mean(1).
    #     ret_x only needs this program's feature slice (second input view).
    x_mean = jnp.mean(x_full_ref[...], axis=1)              # (B, D)  f32
    retx_ref[...] = jnp.mean(x_slice_ref[...], axis=1)      # (B, blk) f32

    # (2) Fused Linear(768->1024, no bias) + BatchNorm1d(eval) + Linear(1024->768, +bias),
    #     folded offline into one (768, blk) bf16 weight + f32 bias.
    proj = jnp.dot(x_mean.astype(jnp.bfloat16), wf_ref[...],
                   preferred_element_type=jnp.float32) + bf_ref[...]   # (B, blk) f32

    # (3) Every box of clip i carries clip-i features in this config, so row k of
    #     vis_output[i] is proj[i] for k < num_boxes_i and zero afterwards.
    #     Box counts are SMEM scalars; build the (B, max_pad) mask with B selects.
    row = lax.broadcasted_iota(jnp.int32, (B, max_pad), 0)
    slot = lax.broadcasted_iota(jnp.int32, (B, max_pad), 1)
    cnt = jnp.zeros((B, max_pad), jnp.int32)
    for i in range(B):                                      # B is small & static
        cnt = jnp.where(row == i, counts_ref[i], cnt)
    mask = (slot < cnt).astype(jnp.float32)                 # (B, max_pad)

    att_ref[...] = mask[None, :, :]                         # per-program slot
    vis_ref[...] = mask[:, :, None] * proj[:, None, :]      # (B, max_pad, blk)


def fold_params(params):
    """One-time (offline) parameter prep: fold eval-mode BN and both Linears
    into a single (768, 768) weight + (1, 768) bias.  Fold done in float64
    numpy (adds no error); the fused weight is stored in bf16 — it is >90% of
    the bytes this kernel moves — while the tiny bias stays f32."""
    w1 = np.asarray(params["w1"], np.float64)          # (768, 1024)
    gamma = np.asarray(params["bn_gamma"], np.float64)
    beta = np.asarray(params["bn_beta"], np.float64)
    rmean = np.asarray(params["bn_rmean"], np.float64)
    rvar = np.asarray(params["bn_rvar"], np.float64)
    w_proj = np.asarray(params["w_proj"], np.float64)  # (1024, 768)
    b_proj = np.asarray(params["b_proj"], np.float64)  # (1, 768)

    s = gamma / np.sqrt(rvar + BN_EPS)                 # (1, 1024)
    w_fused = (w1 * s) @ w_proj                        # (768, 768)
    b_fused = (beta - rmean * s) @ w_proj + b_proj     # (1, 768)
    return (jnp.asarray(w_fused, jnp.bfloat16),
            jnp.asarray(b_fused, jnp.float32))


def transformer_ground_head(inputs, bboxes, w_fused, b_fused, max_bbox_num,
                            *, n_out_splits=1):
    """inputs: (B, T, 768) f32; bboxes: (NB, 5) f32 with integral batch id in col 0.

    n_out_splits: 1 on v5e/v6e (single TensorCore); 2 on v7x so both TCs each
    DMA half of the fused weight (grid axis marked "parallel")."""
    B, T, D = inputs.shape
    d_out = w_fused.shape[1]
    assert D % n_out_splits == 0 and d_out % n_out_splits == 0
    blk_in = D // n_out_splits
    blk_out = d_out // n_out_splits
    assert blk_in % 128 == 0 and blk_out % 128 == 0
    max_pad = ((max_bbox_num + 7) // 8) * 8      # sublane-aligned box dim

    # Per-clip box counts (the only thing the pad/mask step needs) -> SMEM scalars.
    batch_ids = bboxes[:, 0].astype(jnp.int32)                       # (NB,)
    counts = jnp.sum(
        batch_ids[None, :] == jnp.arange(B, dtype=jnp.int32)[:, None],
        axis=1, dtype=jnp.int32)                                     # (B,)

    grid_spec = pltpu.PrefetchScalarGridSpec(
        num_scalar_prefetch=1,
        grid=(n_out_splits,),
        in_specs=[
            # full inputs: every program needs the whole 768-wide row for the dot
            pl.BlockSpec((B, T, D), lambda j, c: (0, 0, 0)),
            # sliced inputs: this program's ret_x feature slice
            pl.BlockSpec((B, T, blk_in), lambda j, c: (0, 0, j)),
            # fused weight / bias column blocks
            pl.BlockSpec((D, blk_out), lambda j, c: (0, j)),
            pl.BlockSpec((1, blk_out), lambda j, c: (0, j)),
        ],
        out_specs=(
            pl.BlockSpec((B, max_pad, blk_out), lambda j, c: (0, 0, j)),  # vis
            pl.BlockSpec((1, B, max_pad), lambda j, c: (j, 0, 0)),        # att (per-program slot)
            pl.BlockSpec((B, blk_in), lambda j, c: (0, j)),               # ret_x
        ),
    )
    out_shapes = (
        jax.ShapeDtypeStruct((B, max_pad, d_out), jnp.float32),           # vis_output (padded)
        jax.ShapeDtypeStruct((n_out_splits, B, max_pad), jnp.float32),    # att_mask (padded)
        jax.ShapeDtypeStruct((B, D), jnp.float32),                        # ret_x
    )

    vis_p, att_p, ret_x = pl.pallas_call(
        _ground_head_kernel,
        out_shape=out_shapes,
        grid_spec=grid_spec,
        compiler_params=pltpu.CompilerParams(
            dimension_semantics=("parallel",)),
    )(counts, inputs, inputs, w_fused, b_fused)

    # Slice the sublane padding back off (wrapper-side, tiny).
    return (vis_p[:, :max_bbox_num, :],
            att_p[0, :, :max_bbox_num],
            ret_x)


if __name__ == "__main__":
    B, T, D = 2, 8, 768          # module hard-codes the 768 input width
    H = 1024                     # dim_out when FASTER.ENABLE = False
    P = 768                      # projection output width
    NB = 6                       # number of boxes across the batch
    MAX_BBOX_NUM = 10            # cfg.MODEL.MAX_BBOX_NUM

    key = jax.random.PRNGKey(0)
    ks = jax.random.split(key, 10)

    inputs = jax.random.normal(ks[0], (B, T, D), jnp.float32)
    batch_ids = jax.random.randint(ks[1], (NB,), 0, B)
    bboxes = jnp.concatenate(
        [batch_ids[:, None].astype(jnp.float32),
         jax.random.uniform(ks[2], (NB, 4), jnp.float32)], axis=1)   # (NB, 5)

    # Synthetic parameters (shapes follow the module __init__, linears stored
    # transposed as (in, out)).
    params = dict(
        w1=jax.random.normal(ks[3], (D, H), jnp.float32) * 0.02,
        bn_gamma=jax.random.uniform(ks[4], (1, H), jnp.float32, 0.5, 1.5),
        bn_beta=jax.random.normal(ks[5], (1, H), jnp.float32) * 0.1,
        bn_rmean=jax.random.normal(ks[6], (1, H), jnp.float32) * 0.1,
        bn_rvar=jax.random.uniform(ks[7], (1, H), jnp.float32, 0.5, 1.5),
        w_proj=jax.random.normal(ks[8], (H, P), jnp.float32) * 0.02,
        b_proj=jax.random.normal(ks[9], (1, P), jnp.float32) * 0.02,
    )

    w_fused, b_fused = fold_params(params)

    # ------------- faithful (unfused) numpy reference of the forward ----------
    x_np = np.asarray(inputs, np.float64)
    xm = x_np.mean(axis=1)                                           # (B, 768)
    h = xm @ np.asarray(params["w1"], np.float64)
    s = np.asarray(params["bn_gamma"], np.float64) / np.sqrt(
        np.asarray(params["bn_rvar"], np.float64) + BN_EPS)
    h = (h - np.asarray(params["bn_rmean"], np.float64)) * s \
        + np.asarray(params["bn_beta"], np.float64)                  # (B, 1024)
    bids = np.asarray(batch_ids)
    x_box = h[bids]                                                  # (NB, 1024)
    xp = x_box @ np.asarray(params["w_proj"], np.float64) \
        + np.asarray(params["b_proj"], np.float64)                   # (NB, 768)

    vis_ref = np.zeros((B, MAX_BBOX_NUM, P), np.float64)
    att_ref = np.zeros((B, MAX_BBOX_NUM), np.float64)
    for i in range(B):
        rows = xp[bids == i]
        n = rows.shape[0]
        vis_ref[i, :n] = rows
        att_ref[i, :n] = 1.0

    # Run both the single-TC (v5e/v6e default) and the dual-TC (v7x) grid split;
    # both are valid on any generation (the split just runs sequentially on 1 TC).
    for n_split in (1, 2):
        vis, att, ret_x = transformer_ground_head(
            inputs, bboxes, w_fused, b_fused, MAX_BBOX_NUM, n_out_splits=n_split)
        jax.block_until_ready((vis, att, ret_x))

        assert vis.shape == (B, MAX_BBOX_NUM, P)
        assert att.shape == (B, MAX_BBOX_NUM)
        assert ret_x.shape == (B, D)
        assert np.allclose(np.asarray(ret_x), xm, atol=1e-5), \
            (n_split, float(np.max(np.abs(np.asarray(ret_x) - xm))))
        assert np.array_equal(np.asarray(att), att_ref.astype(np.float32)), n_split
        # bf16 fused weight -> relaxed tolerance vs. the f64 reference.
        assert np.allclose(np.asarray(vis), vis_ref, atol=2e-2, rtol=2e-2), \
            (n_split, float(np.max(np.abs(np.asarray(vis) - vis_ref))))

    print("KERNEL_OK")
</pallas_src>

<mosaic_0001>
module attributes {stable_mosaic.version = 11 : i64} {
  func.func @_ground_head_kernel(%arg0: i32, %arg1: memref<2xi32, #tpu.memory_space<smem>>, %arg2: memref<2x8x768xf32, #tpu.memory_space<vmem>>, %arg3: memref<2x8x768xf32, #tpu.memory_space<vmem>>, %arg4: memref<768x768xbf16, #tpu.memory_space<vmem>>, %arg5: memref<1x768xf32, #tpu.memory_space<vmem>>, %arg6: memref<2x16x768xf32, #tpu.memory_space<vmem>>, %arg7: memref<1x2x16xf32, #tpu.memory_space<vmem>>, %arg8: memref<2x768xf32, #tpu.memory_space<vmem>>) attributes {dimension_semantics = [#tpu.dimension_semantics<parallel>], iteration_bounds = array<i64: 1>, scalar_prefetch = 1 : i64, scratch_operands = 0 : i64, tpu.core_type = #tpu.core_type<tc>, window_params = [{pipeline_mode = #tpu.pipeline_mode<synchronous>, transform_indices = @transform_0, window_bounds = array<i64: 2, 8, 768>}, {transform_indices = @transform_1, window_bounds = array<i64: 2, 8, 768>}, {transform_indices = @transform_2, window_bounds = array<i64: 768, 768>}, {transform_indices = @transform_3, window_bounds = array<i64: 1, 768>}, {transform_indices = @transform_4, window_bounds = array<i64: 2, 16, 768>}, {transform_indices = @transform_5, window_bounds = array<i64: 1, 2, 16>}, {transform_indices = @transform_6, window_bounds = array<i64: 2, 768>}]} {
    %c0 = arith.constant 0 : index
    %c0_0 = arith.constant 0 : index
    %c0_1 = arith.constant 0 : index
    %0 = vector.load %arg2[%c0, %c0_0, %c0_1] : memref<2x8x768xf32, #tpu.memory_space<vmem>>, vector<2x8x768xf32>
    %cst = arith.constant dense<0.000000e+00> : vector<2x768xf32>
    %1 = vector.multi_reduction <add>, %0, %cst [1] : vector<2x8x768xf32> to vector<2x768xf32>
    %cst_2 = arith.constant 8.000000e+00 : f32
    %2 = vector.broadcast %cst_2 : f32 to vector<2x768xf32>
    %3 = arith.divf %1, %2 : vector<2x768xf32>
    %c0_3 = arith.constant 0 : index
    %c0_4 = arith.constant 0 : index
    %c0_5 = arith.constant 0 : index
    %4 = vector.load %arg3[%c0_3, %c0_4, %c0_5] : memref<2x8x768xf32, #tpu.memory_space<vmem>>, vector<2x8x768xf32>
    %cst_6 = arith.constant dense<0.000000e+00> : vector<2x768xf32>
    %5 = vector.multi_reduction <add>, %4, %cst_6 [1] : vector<2x8x768xf32> to vector<2x768xf32>
    %cst_7 = arith.constant 8.000000e+00 : f32
    %6 = vector.broadcast %cst_7 : f32 to vector<2x768xf32>
    %7 = arith.divf %5, %6 : vector<2x768xf32>
    %c0_8 = arith.constant 0 : index
    %c0_9 = arith.constant 0 : index
    %8 = vector.load %arg8[%c0_8, %c0_9] : memref<2x768xf32, #tpu.memory_space<vmem>>, vector<2x768xf32>
    tpu.vector_store %arg8[%c0_8, %c0_9], %7 {strides = array<i32>} : memref<2x768xf32, #tpu.memory_space<vmem>>, vector<2x768xf32>,
    %9 = arith.truncf %3 : vector<2x768xf32> to vector<2x768xbf16>
    %c0_10 = arith.constant 0 : index
    %c0_11 = arith.constant 0 : index
    %10 = vector.load %arg4[%c0_10, %c0_11] : memref<768x768xbf16, #tpu.memory_space<vmem>>, vector<768x768xbf16>
    %cst_12 = arith.constant dense<0.000000e+00> : vector<2x768xf32>
    %11 = tpu.matmul %9, %10, %cst_12 {dimension_numbers = #tpu.dot_dimension_numbers<[1], [0], [0], [1], [0, 0, 1, 1], [], []>} : vector<2x768xbf16>, vector<768x768xbf16>, vector<2x768xf32> -> vector<2x768xf32>
    %c0_13 = arith.constant 0 : index
    %c0_14 = arith.constant 0 : index
    %12 = vector.load %arg5[%c0_13, %c0_14] : memref<1x768xf32, #tpu.memory_space<vmem>>, vector<1x768xf32>
    %13 = vector.broadcast %12 : vector<1x768xf32> to vector<2x768xf32>
    %14 = arith.addf %11, %13 : vector<2x768xf32>
    %15 = tpu.iota {dimensions = array<i32: 0>} : vector<2x16xi32>
    %16 = tpu.iota {dimensions = array<i32: 1>} : vector<2x16xi32>
    %c0_i32 = arith.constant 0 : i32
    %17 = vector.broadcast %c0_i32 : i32 to vector<2x16xi32>
    %c0_i32_15 = arith.constant 0 : i32
    %18 = vector.broadcast %c0_i32_15 : i32 to vector<2x16xi32>
    %19 = arith.cmpi eq, %15, %18 : vector<2x16xi32>
    %c0_16 = arith.constant 0 : index
    %20 = memref.load %arg1[%c0_16] : memref<2xi32, #tpu.memory_space<smem>>
    %21 = vector.broadcast %20 : i32 to vector<2x16xi32>
    %22 = arith.select %19, %21, %17 : vector<2x16xi1>, vector<2x16xi32>
    %c1_i32 = arith.constant 1 : i32
    %23 = vector.broadcast %c1_i32 : i32 to vector<2x16xi32>
    %24 = arith.cmpi eq, %15, %23 : vector<2x16xi32>
    %c1 = arith.constant 1 : index
    %25 = memref.load %arg1[%c1] : memref<2xi32, #tpu.memory_space<smem>>
    %26 = vector.broadcast %25 : i32 to vector<2x16xi32>
    %27 = arith.select %24, %26, %22 : vector<2x16xi1>, vector<2x16xi32>
    %28 = arith.cmpi slt, %16, %27 : vector<2x16xi32>
    %29 = arith.extui %28 : vector<2x16xi1> to vector<2x16xi32>
    %30 = arith.sitofp %29 : vector<2x16xi32> to vector<2x16xf32>
    %31 = vector.shape_cast %30 : vector<2x16xf32> to vector<1x2x16xf32>
    %c0_17 = arith.constant 0 : index
    %c0_18 = arith.constant 0 : index
    %c0_19 = arith.constant 0 : index
    %32 = vector.load %arg7[%c0_17, %c0_18, %c0_19] : memref<1x2x16xf32, #tpu.memory_space<vmem>>, vector<1x2x16xf32>
    tpu.vector_store %arg7[%c0_17, %c0_18, %c0_19], %31 {strides = array<i32>} : memref<1x2x16xf32, #tpu.memory_space<vmem>>, vector<1x2x16xf32>,
    %33 = vector.shape_cast %30 : vector<2x16xf32> to vector<2x16x1xf32>
    %34 = vector.shape_cast %14 : vector<2x768xf32> to vector<2x1x768xf32>
    %35 = vector.broadcast %33 : vector<2x16x1xf32> to vector<2x16x768xf32>
    %36 = vector.broadcast %34 : vector<2x1x768xf32> to vector<2x16x768xf32>
    %37 = arith.mulf %35, %36 : vector<2x16x768xf32>
    %c0_20 = arith.constant 0 : index
    %c0_21 = arith.constant 0 : index
    %c0_22 = arith.constant 0 : index
    %38 = vector.load %arg6[%c0_20, %c0_21, %c0_22] : memref<2x16x768xf32, #tpu.memory_space<vmem>>, vector<2x16x768xf32>
    tpu.vector_store %arg6[%c0_20, %c0_21, %c0_22], %37 {strides = array<i32>} : memref<2x16x768xf32, #tpu.memory_space<vmem>>, vector<2x16x768xf32>,
    return
  }
  func.func @transform_0(%arg0: i32, %arg1: memref<2xi32, #tpu.memory_space<smem>>) -> (i32, i32, i32) {
    %c0_i32 = arith.constant 0 : i32
    %c0_i32_0 = arith.constant 0 : i32
    %c0_i32_1 = arith.constant 0 : i32
    %c0_i32_2 = arith.constant 0 : i32
    return %c0_i32, %c0_i32_0, %c0_i32_1 : i32, i32, i32
  }
  func.func @transform_1(%arg0: i32, %arg1: memref<2xi32, #tpu.memory_space<smem>>) -> (i32, i32, i32) {
    %c0_i32 = arith.constant 0 : i32
    %c0_i32_0 = arith.constant 0 : i32
    %c0_i32_1 = arith.constant 0 : i32
    return %c0_i32, %c0_i32_0, %arg0 : i32, i32, i32
  }
  func.func @transform_2(%arg0: i32, %arg1: memref<2xi32, #tpu.memory_space<smem>>) -> (i32, i32) {
    %c0_i32 = arith.constant 0 : i32
    %c0_i32_0 = arith.constant 0 : i32
    return %c0_i32, %arg0 : i32, i32
  }
  func.func @transform_3(%arg0: i32, %arg1: memref<2xi32, #tpu.memory_space<smem>>) -> (i32, i32) {
    %c0_i32 = arith.constant 0 : i32
    %c0_i32_0 = arith.constant 0 : i32
    return %c0_i32, %arg0 : i32, i32
  }
  func.func @transform_4(%arg0: i32, %arg1: memref<2xi32, #tpu.memory_space<smem>>) -> (i32, i32, i32) {
    %c0_i32 = arith.constant 0 : i32
    %c0_i32_0 = arith.constant 0 : i32
    %c0_i32_1 = arith.constant 0 : i32
    return %c0_i32, %c0_i32_0, %arg0 : i32, i32, i32
  }
  func.func @transform_5(%arg0: i32, %arg1: memref<2xi32, #tpu.memory_space<smem>>) -> (i32, i32, i32) {
    %c0_i32 = arith.constant 0 : i32
    %c0_i32_0 = arith.constant 0 : i32
    %c0_i32_1 = arith.constant 0 : i32
    return %arg0, %c0_i32, %c0_i32_0 : i32, i32, i32
  }
  func.func @transform_6(%arg0: i32, %arg1: memref<2xi32, #tpu.memory_space<smem>>) -> (i32, i32) {
    %c0_i32 = arith.constant 0 : i32
    %c0_i32_0 = arith.constant 0 : i32
    return %c0_i32, %arg0 : i32, i32
  }
}

</mosaic_0001>

<bundles_post_ra>
// kernel: tpu_custom_call.1
= control target key start
LH: loop header
LB: loop body
LE: loop exit
PB: predicated region body
PF: predicated region fallthrough
CT: control target
= control target key end

     0   :  { %s4000_s0 = inlined_call_operand.hbm [shape: s32[2], index: 0, kind: input, shape index: {}]   ;;  %s4001_s1 = inlined_call_operand.hbm [shape: f32[2,8,768], index: 1, kind: input, shape index: {}]   ;;  %s4002_s2 = inlined_call_operand.hbm [shape: f32[2,8,768], index: 2, kind: input, shape index: {}]   ;;  %s4003_s3 = inlined_call_operand.hbm [shape: bf16[768,768], index: 3, kind: input, shape index: {}]   ;;  %s4004_s4 = inlined_call_operand.hbm [shape: f32[1,768], index: 4, kind: input, shape index: {}]   ;;  %s4005_s5 = inlined_call_operand.hbm [shape: f32[2,16,768], index: 5, kind: output, shape index: {0}]   ;;  %s4006_s6 = inlined_call_operand.hbm [shape: f32[1,2,16], index: 6, kind: output, shape index: {1}]   ;;  %s4007_s7 = inlined_call_operand.hbm [shape: f32[2,768], index: 7, kind: output, shape index: {2}]  }
   0x1   :  { %s3563_s26 = scalar_lea.hbm %s4000_s0, 16 }
   0x2   :  { %p3564_p0 = scmp.ne.s32.totalorder %s4000_s0, %s3563_s26  ;;  %p3567_p1 = scmp.lt.u32.totalorder %s3563_s26, %s4000_s0 }
   0x4   :  { %p3569_p2 = pnand %p3567_p1, %p3564_p0 }
   0x6   :  { %3572 = shalt.err (!%p3569_p2)  }
   0x7   :  { %s3739_s8 = smov [#allocation3]  }
   0x8   :  { %14 = dma.hbm_to_smem %s4000_s0, 16, %s3739_s8, [#allocation2] }
   0x9   :  { %3727 = dma.done.wait [#allocation2], 16 }
   0xa   :  { %3728 = vsyncadd [#allocation2], 4294967280 }
   0xb   :  { %16 = sfence }
   0xc   :  { %17 = vsyncpa [#allocation5], 0 }
   0xd   :  { %18 = vsyncpa [#allocation8], 0 }
   0xe   :  { %19 = vsyncpa [#allocation11], 0 }
   0xf   :  { %20 = vsyncpa [#allocation6], 0 }
  0x10   :  { %21 = vsyncpa [#allocation14], 0  ;;  %s3740_s11 = smov [#allocation7]   ;;  %s3741_s13 = smov [#allocation4]  }
  0x11   :  { %s39_s12 = sshll.u32 %s3740_s11, 4  ;;  %s27_s14 = sshll.u32 %s3741_s13, 4  ;;  %s40_s12 = int_to_ptr.vmem [resolvable:$true] %s39_s12  ;;  %s3806_s14 = int_to_ptr.vmem [resolvable:$true] %s27_s14 }
  0x12   :  { %s3573_s17 = scalar_lea.hbm %s4002_s2, 1536 }
  0x13   :  { %p3574_p3 = scmp.ne.s32.totalorder %s4002_s2, %s3573_s17  ;;  %p3577_p4 = scmp.lt.u32.totalorder %s3573_s17, %s4002_s2 }
  0x15   :  { %p3579_p5 = pnand %p3577_p4, %p3574_p3 }
  0x17   :  { %3582 = shalt.err (!%p3579_p5)
}
  0x18   :  { %s3583_s21 = scalar_lea.vmem %s40_s12, 1536  ;;  %p3588_p7 = scmp.lt.s32.totalorder %s40_s12, %s40_s12 }
  0x19   :  { %p3584_p6 = scmp.ne.s32.totalorder %s40_s12, %s3583_s21  ;;  %p3589_p8 = scmp.lt.s32.totalorder %s3583_s21, %s3583_s21 }
  0x1b   :  { %p3590_p9 = por %p3589_p8, %p3588_p7 }
  0x1d   :  { %p3591_p10 = pnand %p3590_p9, %p3584_p6 }
  0x1f   :  { %3594 = shalt.err (!%p3591_p10)
}
  0x20   :  { %s3742_s22 = smov 768   ;;  %s3743_s23 = smov 48  }
  0x21   :  { %45 = dma.hbm_to_vmem [thread:$0]  %s4002_s2, 1536, %s40_s12, [#allocation8], %s3742_s22, %s3742_s22, %s3743_s23  }
  0x22   :  { %s3595_s28 = scalar_lea.hbm %s4001_s1, 1536 }
  0x23   :  { %p3596_p11 = scmp.ne.s32.totalorder %s4001_s1, %s3595_s28  ;;  %p3599_p12 = scmp.lt.u32.totalorder %s3595_s28, %s4001_s1 }
  0x25   :  { %p3601_p13 = pnand %p3599_p12, %p3596_p11 }
  0x27   :  { %3604 = shalt.err (!%p3601_p13)
}
  0x28   :  { %s3605_s10 = scalar_lea.vmem %s3806_s14, 1536  ;;  %p3610_p1 = scmp.lt.s32.totalorder %s3806_s14, %s3806_s14 }
  0x29   :  { %p3606_p0 = scmp.ne.s32.totalorder %s3806_s14, %s3605_s10  ;;  %p3611_p2 = scmp.lt.s32.totalorder %s3605_s10, %s3605_s10 }
  0x2b   :  { %p3612_p3 = por %p3611_p2, %p3610_p1 }
  0x2d   :  { %p3613_p4 = pnand %p3612_p3, %p3606_p0 }
  0x2f   :  { %3616 = shalt.err (!%p3613_p4)
}
  0x30   :  { %33 = dma.hbm_to_vmem [thread:$0]  %s4001_s1, 1536, %s3806_s14, [#allocation5], %s3742_s22, %s3742_s22, %s3743_s23  }
  0x31   :  { %s3744_s12 = smov [#allocation9]   ;;  %s3617_s17 = scalar_lea.hbm %s4003_s3, 36864 }
  0x32   :  { %s51_s13 = sshll.u32 %s3744_s12, 4  ;;  %p3618_p5 = scmp.ne.s32.totalorder %s4003_s3, %s3617_s17  ;;  %s52_s13 = int_to_ptr.vmem [resolvable:$true] %s51_s13 }
  0x33   :  { %p3621_p6 = scmp.lt.u32.totalorder %s3617_s17, %s4003_s3 }
  0x35   :  { %p3623_p7 = pnand %p3621_p6, %p3618_p5 }
  0x37   :  { %3626 = shalt.err (!%p3623_p7)
}
  0x38   :  { %s3627_s21 = scalar_lea.vmem %s52_s13, 36864  ;;  %p3632_p9 = scmp.lt.s32.totalorder %s52_s13, %s52_s13 }
  0x39   :  { %p3628_p8 = scmp.ne.s32.totalorder %s52_s13, %s3627_s21  ;;  %p3633_p10 = scmp.lt.s32.totalorder %s3627_s21, %s3627_s21 }
  0x3b   :  { %p3634_p11 = por %p3633_p10, %p3632_p9 }
  0x3d   :  { %p3635_p12 = pnand %p3634_p11, %p3628_p8 }
  0x3f   :  { %3638 = shalt.err (!%p3635_p12)
}
  0x40   :  { %s3745_s1 = smov 384   ;;  %s3746_s14 = smov 24  }
  0x41   :  { %57 = dma.hbm_to_vmem [thread:$0]  %s4003_s3, 36864, %s52_s13, [#allocation8], %s3745_s1, %s3745_s1, %s3746_s14  }
  0x42   :  { %s3747_s26 = smov [#allocation10]   ;;  %s3639_s30 = scalar_lea.hbm %s4004_s4, 96 }
  0x43   :  { %s64_s27 = sshll.u32 %s3747_s26, 4  ;;  %p3640_p13 = scmp.ne.s32.totalorder %s4004_s4, %s3639_s30  ;;  %s65_s27 = int_to_ptr.vmem [resolvable:$true] %s64_s27 }
  0x44   :  { %p3643_p0 = scmp.lt.u32.totalorder %s3639_s30, %s4004_s4 }
  0x46   :  { %p3645_p1 = pnand %p3643_p0, %p3640_p13 }
  0x48   :  { %3648 = shalt.err (!%p3645_p1)
}
  0x49   :  { %s3649_s11 = scalar_lea.vmem %s65_s27, 96  ;;  %p3654_p3 = scmp.lt.s32.totalorder %s65_s27, %s65_s27 }
  0x4a   :  { %p3650_p2 = scmp.ne.s32.totalorder %s65_s27, %s3649_s11  ;;  %p3655_p4 = scmp.lt.s32.totalorder %s3649_s11, %s3649_s11 }
  0x4c   :  { %p3656_p5 = por %p3655_p4, %p3654_p3 }
  0x4e   :  { %p3657_p6 = pnand %p3656_p5, %p3650_p2 }
  0x50   :  { %3660 = shalt.err (!%p3657_p6)
}
  0x51   :  { %67 = dma.hbm_to_vmem [thread:$0]  %s4004_s4, 96, %s65_s27, [#allocation11]  }
  0x52   :  { %3729 = dma.done.wait [#allocation5], 1536  }
  0x53   :  { %3730 = vsyncadd [#allocation5], 4294965760 }
  0x54   :  { %3731 = dma.done.wait [#allocation8], 38400  }
  0x55   :  { %3732 = vsyncadd [#allocation8], 4294928896 }
  0x56   :  { %3733 = dma.done.wait [#allocation11], 96  }
  0x57   :  { %3734 = vsyncadd [#allocation11], 4294967200  ;;  %v3131_v0 = vld [vmem:[#allocation9 + $0x4] ss:$24 sps:$4 sm:$0xff]   ;;  %v3135_v2 = vld [vmem:[#allocation9] ss:$24 sps:$4 sm:$0xff]  }
  0x58   :  { %v3133_v1 = vld [vmem:[#allocation9 + $0x304] ss:$24 sps:$4 sm:$0xff]   ;;  %2173 = vmatprep.subr.bf16.mxu1 %v3131_v0  ;;  %v3136_v3 = vld [vmem:[#allocation9 + $0x300] ss:$24 sps:$4 sm:$0xff]   ;;  %v3137_v4 = vld [vmem:[#allocation9 + $0x34] ss:$24 sps:$4 sm:$0xff]  }
  0x59   :  { %2214 = vmatprep.subr.bf16.mxu0 %v3133_v1  ;;  %2174 = vmatpush1.bf16.msra.mxu1 %v3135_v2  ;;  %v3139_v5 = vld [vmem:[#allocation9 + $0x334] ss:$24 sps:$4 sm:$0xff]   ;;  %v3141_v6 = vld [vmem:[#allocation9 + $0x30] ss:$24 sps:$4 sm:$0xff]   ;;  %v3143_v8 = vld [vmem:[#allocation9 + $0x64] ss:$24 sps:$4 sm:$0xff]  }
  0x5a   :  { %2215 = vmatpush1.bf16.msra.mxu0 %v3136_v3  ;;  %2175 = vmatprep.subr.bf16.mxu1 %v3137_v4  ;;  %v3142_v7 = vld [vmem:[#allocation9 + $0x330] ss:$24 sps:$4 sm:$0xff]   ;;  %v3145_v9 = vld [vmem:[#allocation9 + $0x364] ss:$24 sps:$4 sm:$0xff]   ;;  %v3147_v10 = vld [vmem:[#allocation9 + $0x60] ss:$24 sps:$4 sm:$0xff]  }
  0x5b   :  { %2216 = vmatprep.subr.bf16.mxu0 %v3139_v5  ;;  %v3148_v11 = vld [vmem:[#allocation9 + $0x360] ss:$24 sps:$4 sm:$0xff]   ;;  %v3149_v12 = vld [vmem:[#allocation9 + $0x94] ss:$24 sps:$4 sm:$0xff]   ;;  %v3153_v14 = vld [vmem:[#allocation9 + $0x90] ss:$24 sps:$4 sm:$0xff]  }
  0x5c   :  { %v3151_v13 = vld [vmem:[#allocation9 + $0x394] ss:$24 sps:$4 sm:$0xff]   ;;  %v3154_v15 = vld [vmem:[#allocation9 + $0x390] ss:$24 sps:$4 sm:$0xff]   ;;  %v3155_v16 = vld [vmem:[#allocation9 + $0xc4] ss:$24 sps:$4 sm:$0xff]  }
  0x5d   :  { %2176 = vmatpush1.bf16.msra.mxu1 %v3141_v6  ;;  %v3157_v17 = vld [vmem:[#allocation9 + $0x3c4] ss:$24 sps:$4 sm:$0xff]   ;;  %v3159_v18 = vld [vmem:[#allocation9 + $0xc0] ss:$24 sps:$4 sm:$0xff]   ;;  %v3161_v20 = vld [vmem:[#allocation9 + $0xf4] ss:$24 sps:$4 sm:$0xff]  }
  0x5e   :  { %2217 = vmatpush1.bf16.msra.mxu0 %v3142_v7  ;;  %2177 = vmatprep.subr.bf16.mxu1 %v3143_v8  ;;  %v3160_v19 = vld [vmem:[#allocation9 + $0x3c0] ss:$24 sps:$4 sm:$0xff]   ;;  %v3163_v21 = vld [vmem:[#allocation9 + $0x3f4] ss:$24 sps:$4 sm:$0xff]   ;;  %v3165_v22 = vld [vmem:[#allocation9 + $0xf0] ss:$24 sps:$4 sm:$0xff]  }
  0x5f   :  { %2218 = vmatprep.subr.bf16.mxu0 %v3145_v9  ;;  %v3166_v23 = vld [vmem:[#allocation9 + $0x3f0] ss:$24 sps:$4 sm:$0xff]   ;;  %v3167_v24 = vld [vmem:[#allocation9 + $0x124] ss:$24 sps:$4 sm:$0xff]   ;;  %v3171_v26 = vld [vmem:[#allocation9 + $0x120] ss:$24 sps:$4 sm:$0xff]  }
  0x60   :  { %v3169_v25 = vld [vmem:[#allocation9 + $0x424] ss:$24 sps:$4 sm:$0xff]   ;;  %v3172_v27 = vld [vmem:[#allocation9 + $0x420] ss:$24 sps:$4 sm:$0xff]   ;;  %v3173_v28 = vld [vmem:[#allocation9 + $0x154] ss:$24 sps:$4 sm:$0xff]  }
  0x61   :  { %2178 = vmatpush1.bf16.msra.mxu1 %v3147_v10  ;;  %v3175_v29 = vld [vmem:[#allocation9 + $0x454] ss:$24 sps:$4 sm:$0xff]   ;;  %v3177_v30 = vld [vmem:[#allocation9 + $0x150] ss:$24 sps:$4 sm:$0xff]   ;;  %v3179_v32 = vld [vmem:[#allocation9 + $0x184] ss:$24 sps:$4 sm:$0xff]  }
  0x62   :  { %2219 = vmatpush1.bf16.msra.mxu0 %v3148_v11  ;;  %2179 = vmatprep.subr.bf16.mxu1 %v3149_v12  ;;  %v3178_v31 = vld [vmem:[#allocation9 + $0x450] ss:$24 sps:$4 sm:$0xff]   ;;  %v3181_v33 = vld [vmem:[#allocation9 + $0x484] ss:$24 sps:$4 sm:$0xff]   ;;  %v3183_v34 = vld [vmem:[#allocation9 + $0x180] ss:$24 sps:$4 sm:$0xff]  }
  0x63   :  { %2220 = vmatprep.subr.bf16.mxu0 %v3151_v13  ;;  %v3184_v35 = vld [vmem:[#allocation9 + $0x480] ss:$24 sps:$4 sm:$0xff]   ;;  %v3185_v36 = vld [vmem:[#allocation9 + $0x1b4] ss:$24 sps:$4 sm:$0xff]   ;;  %v3189_v38 = vld [vmem:[#allocation9 + $0x1b0] ss:$24 sps:$4 sm:$0xff]  }
  0x64   :  { %v3187_v37 = vld [vmem:[#allocation9 + $0x4b4] ss:$24 sps:$4 sm:$0xff]   ;;  %v3190_v39 = vld [vmem:[#allocation9 + $0x4b0] ss:$24 sps:$4 sm:$0xff]   ;;  %v3191_v40 = vld [vmem:[#allocation9 + $0x1e4] ss:$24 sps:$4 sm:$0xff]  }
  0x65   :  { %2180 = vmatpush1.bf16.msra.mxu1 %v3153_v14  ;;  %v3193_v41 = vld [vmem:[#allocation9 + $0x4e4] ss:$24 sps:$4 sm:$0xff]   ;;  %v3195_v42 = vld [vmem:[#allocation9 + $0x1e0] ss:$24 sps:$4 sm:$0xff]   ;;  %v3197_v44 = vld [vmem:[#allocation9 + $0x214] ss:$24 sps:$4 sm:$0xff]  }
  0x66   :  { %2221 = vmatpush1.bf16.msra.mxu0 %v3154_v15  ;;  %2181 = vmatprep.subr.bf16.mxu1 %v3155_v16  ;;  %v3196_v43 = vld [vmem:[#allocation9 + $0x4e0] ss:$24 sps:$4 sm:$0xff]   ;;  %v3199_v45 = vld [vmem:[#allocation9 + $0x514] ss:$24 sps:$4 sm:$0xff]   ;;  %v3201_v46 = vld [vmem:[#allocation9 + $0x210] ss:$24 sps:$4 sm:$0xff]  }
  0x67   :  { %2222 = vmatprep.subr.bf16.mxu0 %v3157_v17  ;;  %v3202_v47 = vld [vmem:[#allocation9 + $0x510] ss:$24 sps:$4 sm:$0xff]   ;;  %v87_v49 = vld [vmem:[#allocation4 + $0x38] sm:$0xff]  ;;  %v80_v0 = vld [vmem:[#allocation4] sm:$0xff]  ;;  %vm340_vm0 = vcmask 1041409   ;;  %s2547_s4 = sld [smem:[#allocation3]] }
  0x68   :  { %v81_v48 = vld [vmem:[#allocation4 + $0x8] sm:$0xff]  ;;  %v83_v51 = vld [vmem:[#allocation4 + $0x18] sm:$0xff]  ;;  %v134_v53 = vrot.slane %v87_v49, 4  ;;  %v86_v2 = vld [vmem:[#allocation4 + $0x30] sm:$0xff]  ;;  %v92_v3 = vrot.slane %v80_v0, 4  ;;  %s3086_s13 = sld [smem:[#allocation3 + $0x1]] }
  0x69   :  { %2182 = vmatpush1.bf16.msra.mxu1 %v3159_v18  ;;  %v98_v50 = vrot.slane %v81_v48, 4  ;;  %v89_v52 = vld [vmem:[#allocation4 + $0x48] sm:$0xff]  ;;  %v110_v54 = vrot.slane %v83_v51, 4  ;;  %v3203_v56 = vld [vmem:[#allocation9 + $0x244] ss:$24 sps:$4 sm:$0xff]   ;;  %v82_v4 = vld [vmem:[#allocation4 + $0x10] sm:$0xff] }
  0x6a   :  { %2223 = vmatpush1.bf16.msra.mxu0 %v3160_v19  ;;  %2183 = vmatprep.subr.bf16.mxu1 %v3161_v20  ;;  %v146_v55 = vrot.slane %v89_v52, 4  ;;  %v3205_v57 = vld [vmem:[#allocation9 + $0x544] ss:$24 sps:$4 sm:$0xff]   ;;  %v3207_v59 = vld [vmem:[#allocation9 + $0x240] ss:$24 sps:$4 sm:$0xff]   ;;  %v135_v61 = vadd.f32 %v134_v53, %v87_v49  ;;  %v128_v9 = vrot.slane %v86_v2, 4  ;;  %v93_v13 = vadd.f32 %v92_v3, %v80_v0 }
  0x6b   :  { %2224 = vmatprep.subr.bf16.mxu0 %v3163_v21  ;;  %v99_v58 = vadd.f32 %v98_v50, %v81_v48  ;;  %v3208_v60 = vld [vmem:[#allocation9 + $0x540] ss:$24 sps:$4 sm:$0xff]   ;;  %v111_v62 = vadd.f32 %v110_v54, %v83_v51  ;;  %v3209_v10 = vld [vmem:[#allocation9 + $0x274] ss:$24 sps:$4 sm:$0xff]   ;;  %v104_v14 = vrot.slane %v82_v4, 4  ;;  %vm2557_vm4 = vcmask 123904  }
  0x6c   :  { %v147_v63 = vadd.f32 %v146_v55, %v89_v52  ;;  %v88_v5 = vld [vmem:[#allocation4 + $0x40] sm:$0xff]  ;;  %v136_v6 = vrot.slane %v135_v61, 2  ;;  %v3211_v11 = vld [vmem:[#allocation9 + $0x574] ss:$24 sps:$4 sm:$0xff]   ;;  %v3213_v16 = vld [vmem:[#allocation9 + $0x270] ss:$24 sps:$4 sm:$0xff]   ;;  %v129_v20 = vadd.f32 %v128_v9, %v86_v2 }
  0x6d   :  { %2184 = vmatpush1.bf16.msra.mxu1 %v3165_v22  ;;  %v100_v1 = vrot.slane %v99_v58, 2  ;;  %v112_v7 = vrot.slane %v111_v62, 2  ;;  %v140_v15 = vrot.slane %v88_v5, 4  ;;  %v3214_v21 = vld [vmem:[#allocation9 + $0x570] ss:$24 sps:$4 sm:$0xff]   ;;  %s3750_s15 = smov [#allocation13]  }
  0x6e   :  { %2225 = vmatpush1.bf16.msra.mxu0 %v3166_v23  ;;  %2185 = vmatprep.subr.bf16.mxu1 %v3167_v24  ;;  %v148_v8 = vrot.slane %v147_v63, 2  ;;  %v137_v17 = vadd.f32 %v136_v6, %v135_v61  ;;  %v94_v23 = vrot.slane %v93_v13, 2  ;;  %v105_v24 = vadd.f32 %v104_v14, %v82_v4  ;;  %v3223_v51 = vld [vmem:[#allocation9 + $0x5d4] ss:$24 sps:$4 sm:$0xff]   ;;  %v3225_v0 = vld [vmem:[#allocation9 + $0x2d0] ss:$24 sps:$4 sm:$0xff]  }
  0x6f   :  { %2226 = vmatprep.subr.bf16.mxu0 %v3169_v25  ;;  %v101_v12 = vadd.f32 %v100_v1, %v99_v58  ;;  %v113_v18 = vadd.f32 %v112_v7, %v111_v62  ;;  %v141_v25 = vadd.f32 %v140_v15, %v88_v5  ;;  %v3226_v1 = vld [vmem:[#allocation9 + $0x5d0] ss:$24 sps:$4 sm:$0xff]   ;;  %s2770_s16 = sshll.u32 %s3750_s15, 4  ;;  %s2771_s16 = int_to_ptr.vmem [resolvable:$true] %s2770_s16 }
  0x70   :  { %v149_v19 = vadd.f32 %v148_v8, %v147_v63  ;;  %s3661_s17 = scalar_lea.vmem %s2771_s16, 32  ;;  %p3666_p8 = scmp.lt.s32.totalorder %s2771_s16, %s2771_s16 }
  0x71   :  { %2186 = vmatpush1.bf16.msra.mxu1 %v3171_v26  ;;  %v102_v22 = vrot.slane %v101_v12, 1  ;;  %v3215_v26 = vld [vmem:[#allocation9 + $0x2a4] ss:$24 sps:$4 sm:$0xff]   ;;  %p3662_p7 = scmp.ne.s32.totalorder %s2771_s16, %s3661_s17  ;;  %p3667_p9 = scmp.lt.s32.totalorder %s3661_s17, %s3661_s17 }
  0x72   :  { %2227 = vmatpush1.bf16.msra.mxu0 %v3172_v27  ;;  %2187 = vmatprep.subr.bf16.mxu1 %v3173_v28  ;;  %v138_v27 = vrot.slane %v137_v17, 1  ;;  %v114_v28 = vrot.slane %v113_v18, 1 }
  0x73   :  { %2228 = vmatprep.subr.bf16.mxu0 %v3175_v29  ;;  %v150_v29 = vrot.slane %v149_v19, 1  ;;  %p3668_p10 = por %p3667_p9, %p3666_p8 }
  0x75   :  { %2188 = vmatpush1.bf16.msra.mxu1 %v3177_v30  ;;  %v130_v30 = vrot.slane %v129_v20, 2  ;;  %p3669_p11 = pnand %p3668_p10, %p3662_p7 }
  0x76   :  { %2229 = vmatpush1.bf16.msra.mxu0 %v3178_v31  ;;  %2189 = vmatprep.subr.bf16.mxu1 %v3179_v32  ;;  %v3217_v31 = vld [vmem:[#allocation9 + $0x5a4] ss:$24 sps:$4 sm:$0xff]   ;;  %v103_v32 = vadd.f32 %v102_v22, %v101_v12 }
  0x77   :  { %2230 = vmatprep.subr.bf16.mxu0 %v3181_v33  ;;  %v95_v33 = vadd.f32 %v94_v23, %v93_v13  ;;  %v3232_v12 = vld [vmem:[#allocation9 + $0xc] ss:$24 sps:$4 sm:$0xff]  }
  0x79   :  { %2190 = vmatpush1.bf16.msra.mxu1 %v3183_v34  ;;  %v106_v34 = vrot.slane %v105_v24, 2 }
  0x7a   :  { %2231 = vmatpush1.bf16.msra.mxu0 %v3184_v35  ;;  %2191 = vmatprep.subr.bf16.mxu1 %v3185_v36  ;;  %v142_v35 = vrot.slane %v141_v25, 2  ;;  %v3219_v36 = vld [vmem:[#allocation9 + $0x2a0] ss:$24 sps:$4 sm:$0xff]  }
  0x7b   :  { %2232 = vmatprep.subr.bf16.mxu0 %v3187_v37  ;;  %v139_v37 = vadd.f32 %v138_v27, %v137_v17 }
  0x7d   :  { %2192 = vmatpush1.bf16.msra.mxu1 %v3189_v38  ;;  %v115_v38 = vadd.f32 %v114_v28, %v113_v18 }
  0x7e   :  { %2233 = vmatpush1.bf16.msra.mxu0 %v3190_v39  ;;  %2193 = vmatprep.subr.bf16.mxu1 %v3191_v40  ;;  %v151_v39 = vadd.f32 %v150_v29, %v149_v19  ;;  %v131_v40 = vadd.f32 %v130_v30, %v129_v20  ;;  %v3235_v29 = vld [vmem:[#allocation9 + $0x634] ss:$24 sps:$4 sm:$0xff]   ;;  %v3236_v30 = vld [vmem:[#allocation9 + $0x38] ss:$24 sps:$4 sm:$0xff]  }
  0x7f   :  { %2234 = vmatprep.subr.bf16.mxu0 %v3193_v41  ;;  %v3220_v41 = vld [vmem:[#allocation9 + $0x5a0] ss:$24 sps:$4 sm:$0xff]   ;;  %v168_v48 = vmul.f32 0.125, %v115_v38 }
  0x80   :  { %v174_v49 = vmul.f32 0.125, %v151_v39  ;;  %v132_v50 = vrot.slane %v131_v40, 1  ;;  %v3248_v38 = vld [vmem:[#allocation9 + $0x98] ss:$24 sps:$4 sm:$0xff]   ;;  %v3256_v39 = vld [vmem:[#allocation9 + $0xcc] ss:$24 sps:$4 sm:$0xff]  }
  0x81   :  { %2194 = vmatpush1.bf16.msra.mxu1 %v3195_v42  ;;  %v166_v42 = vmul.f32 0.125, %v103_v32  ;;  %v3233_v32 = vld [vmem:[#allocation9 + $0x630] ss:$24 sps:$4 sm:$0xff]  }
  0x82   :  { %2235 = vmatpush1.bf16.msra.mxu0 %v3196_v43  ;;  %2195 = vmatprep.subr.bf16.mxu1 %v3197_v44  ;;  %v96_v43 = vrot.slane %v95_v33, 1  ;;  %v107_v44 = vadd.f32 %v106_v34, %v105_v24  ;;  %v368_v58 = vpack.c.bf16 %v174_v49, %v174_v49  ;;  %v3242_v34 = vld [vmem:[#allocation9 + $0x68] ss:$24 sps:$4 sm:$0xff]   ;;  %v3265_v49 = vld [vmem:[#allocation9 + $0x724] ss:$24 sps:$4 sm:$0xff]  }
  0x83   :  { %2236 = vmatprep.subr.bf16.mxu0 %v3199_v45  ;;  %v143_v45 = vadd.f32 %v142_v35, %v141_v25  ;;  %v360_v52 = vpack.c.bf16 %v166_v42, %v166_v42  ;;  %v3238_v25 = vld [vmem:[#allocation9 + $0x3c] ss:$24 sps:$4 sm:$0xff]   ;;  %v3254_v42 = vld [vmem:[#allocation9 + $0xc8] ss:$24 sps:$4 sm:$0xff]  }
  0x84   :  { %v97_v53 = vadd.f32 %v96_v43, %v95_v33  ;;  %v108_v54 = vrot.slane %v107_v44, 1  ;;  %v712_v4 = vunpack.c.l.b16 %v368_v58  ;;  %v3241_v33 = vld [vmem:[#allocation9 + $0x664] ss:$24 sps:$4 sm:$0xff]   ;;  %v3263_v58 = vld [vmem:[#allocation9 + $0x720] ss:$24 sps:$4 sm:$0xff]  }
  0x85   :  { %2196 = vmatpush1.bf16.msra.mxu1 %v3201_v46  ;;  %v3221_v46 = vld [vmem:[#allocation9 + $0x2d4] ss:$24 sps:$4 sm:$0xff]   ;;  %v144_v55 = vrot.slane %v143_v45, 1 }
  0x86   :  { %2237 = vmatpush1.bf16.msra.mxu0 %v3202_v47  ;;  %2197 = vmatprep.subr.bf16.mxu1 %v3203_v56  ;;  %v172_v47 = vmul.f32 0.125, %v139_v37  ;;  %v165_v61 = vmul.f32 0.125, %v97_v53  ;;  %v109_v62 = vadd.f32 %v108_v54, %v107_v44  ;;  %v3250_v35 = vld [vmem:[#allocation9 + $0x9c] ss:$24 sps:$4 sm:$0xff]   ;;  %v3251_v44 = vld [vmem:[#allocation9 + $0x6c0] ss:$24 sps:$4 sm:$0xff]  }
  0x87   :  { %2238 = vmatprep.subr.bf16.mxu0 %v3205_v57  ;;  %v362_v57 = vpack.c.bf16 %v168_v48, %v168_v48  ;;  %v145_v63 = vadd.f32 %v144_v55, %v143_v45  ;;  %v3247_v37 = vld [vmem:[#allocation9 + $0x694] ss:$24 sps:$4 sm:$0xff]   ;;  %v3257_v48 = vld [vmem:[#allocation9 + $0x6f0] ss:$24 sps:$4 sm:$0xff]   ;;  %v91_v53 = vld [vmem:[#allocation4 + $0x58] sm:$0xff] }
  0x88   :  { %v366_v56 = vpack.c.bf16 %v172_v47, %v172_v47  ;;  %v359_v6 = vpack.c.bf16 %v165_v61, %v165_v61  ;;  %v167_v7 = vmul.f32 0.125, %v109_v62  ;;  %v3262_v43 = vld [vmem:[#allocation9 + $0xfc] ss:$24 sps:$4 sm:$0xff]   ;;  %v3268_v47 = vld [vmem:[#allocation9 + $0x12c] ss:$24 sps:$4 sm:$0xff]  }
  0x89   :  { %2198 = vmatpush1.bf16.msra.mxu1 %v3207_v59  ;;  %v133_v59 = vadd.f32 %v132_v50, %v131_v40  ;;  %v706_v3 = vunpack.c.l.b16 %v362_v57  ;;  %v173_v8 = vmul.f32 0.125, %v145_v63  ;;  %v3245_v40 = vld [vmem:[#allocation9 + $0x690] ss:$24 sps:$4 sm:$0xff]   ;;  %v3259_v45 = vld [vmem:[#allocation9 + $0x6f4] ss:$24 sps:$4 sm:$0xff]   ;;  %v84_v54 = vld [vmem:[#allocation4 + $0x20] sm:$0xff] }
  0x8a   :  { %2239 = vmatpush1.bf16.msra.mxu0 %v3208_v60  ;;  %2199 = vmatprep.subr.bf16.mxu1 %v3209_v10  ;;  %v704_v60 = vunpack.c.l.b16 %v360_v52  ;;  %v710_v2 = vunpack.c.l.b16 %v366_v56  ;;  %v361_v17 = vpack.c.bf16 %v167_v7, %v167_v7  ;;  %v3266_v50 = vld [vmem:[#allocation9 + $0x128] ss:$24 sps:$4 sm:$0xff]   ;;  %v158_v56 = vrot.slane %v91_v53, 4  ;;  %v90_v57 = vld [vmem:[#allocation4 + $0x50] sm:$0xff]  ;;  %v3277_v7 = vld [vmem:[#allocation9 + $0x784] ss:$24 sps:$4 sm:$0xff]  }
  0x8b   :  { %2240 = vmatprep.subr.bf16.mxu0 %v3211_v11  ;;  %v171_v5 = vmul.f32 0.125, %v133_v59  ;;  %v718_v10 = vsel %vm340_vm0, %v712_v4, %v706_v3  ;;  %v3229_v11 = vld [vmem:[#allocation9 + $0x604] ss:$24 sps:$4 sm:$0xff]   ;;  %v367_v19 = vpack.c.bf16 %v173_v8, %v173_v8  ;;  %v85_v52 = vld [vmem:[#allocation4 + $0x28] sm:$0xff]  ;;  %v116_v59 = vrot.slane %v84_v54, 4 }
  0x8c   :  { %v716_v9 = vsel %vm340_vm0, %v710_v2, %v704_v60  ;;  %v3871_v15 = vpack.c.b16 %v718_v10, %v718_v10  ;;  %v705_v20 = vunpack.c.l.b16 %v361_v17  ;;  %v122_v55 = vrot.slane %v85_v52, 4  ;;  %v3271_v61 = vld [vmem:[#allocation9 + $0x754] ss:$24 sps:$4 sm:$0xff]   ;;  %v3269_v4 = vld [vmem:[#allocation9 + $0x750] ss:$24 sps:$4 sm:$0xff]  }
  0x8d   :  { %2200 = vmatpush1.bf16.msra.mxu1 %v3213_v16  ;;  %v365_v13 = vpack.c.bf16 %v171_v5, %v171_v5  ;;  %v3869_v14 = vpack.c.b16 %v716_v9, %v716_v9  ;;  %v703_v16 = vunpack.c.l.b16 %v359_v6  ;;  %v711_v23 = vunpack.c.l.b16 %v367_v19  ;;  %v3278_v10 = vld [vmem:[#allocation9 + $0x188] ss:$24 sps:$4 sm:$0xff]   ;;  %v3283_v19 = vld [vmem:[#allocation9 + $0x7b4] ss:$24 sps:$4 sm:$0xff]  }
  0x8e   :  { %2241 = vmatpush1.bf16.msra.mxu0 %v3214_v21  ;;  %2201 = vmatprep.subr.bf16.mxu1 %v3215_v26  ;;  %v3230_v21 = vld [vmem:[#allocation9 + $0x8] ss:$24 sps:$4 sm:$0xff]   ;;  %v152_v60 = vrot.slane %v90_v57, 4  ;;  %v123_v62 = vadd.f32 %v122_v55, %v85_v52  ;;  %v159_v63 = vadd.f32 %v158_v56, %v91_v53  ;;  %v117_v5 = vadd.f32 %v116_v59, %v84_v54  ;;  %v3307_v55 = vld [vmem:[#allocation9 + $0x874] ss:$24 sps:$4 sm:$0xff]  }
  0x8f   :  { %2242 = vmatprep.subr.bf16.mxu0 %v3217_v31  ;;  %v709_v18 = vunpack.c.l.b16 %v365_v13  ;;  %2205 = vmatprep.mubr.bf16.mxu1 %v3869_v14  ;;  %v3227_v26 = vld [vmem:[#allocation9 + $0x600] ss:$24 sps:$4 sm:$0xff]   ;;  %v717_v27 = vsel %vm340_vm0, %v711_v23, %v705_v20  ;;  %v3244_v31 = vld [vmem:[#allocation9 + $0x6c] ss:$24 sps:$4 sm:$0xff]  }
  0x90   :  { %2246 = vmatprep.mubr.bf16.mxu0 %v3871_v15  ;;  %v3880_v28 = vpack.c.b16 %v717_v27, %v717_v27  ;;  %v124_v2 = vrot.slane %v123_v62, 2  ;;  %v160_v3 = vrot.slane %v159_v63, 2  ;;  %v153_v6 = vadd.f32 %v152_v60, %v90_v57  ;;  %v3292_v23 = vld [vmem:[#allocation9 + $0x1ec] ss:$24 sps:$4 sm:$0xff]   ;;  %v3281_v27 = vld [vmem:[#allocation9 + $0x7b0] ss:$24 sps:$4 sm:$0xff]  }
  0x91   :  { %2202 = vmatpush1.bf16.msra.mxu1 %v3219_v36  ;;  %v715_v22 = vsel %vm340_vm0, %v709_v18, %v703_v16  ;;  %v3239_v36 = vld [vmem:[#allocation9 + $0x660] ss:$24 sps:$4 sm:$0xff]   ;;  %v118_v17 = vrot.slane %v117_v5, 2  ;;  %v3316_v57 = vld [vmem:[#allocation9 + $0x2ac] ss:$24 sps:$4 sm:$0xff]  }
  0x92   :  { %2243 = vmatpush1.bf16.msra.mxu0 %v3220_v41  ;;  %2203 = vmatprep.subr.bf16.mxu1 %v3221_v46  ;;  %v3876_v24 = vpack.c.b16 %v715_v22, %v715_v22  ;;  %v3253_v41 = vld [vmem:[#allocation9 + $0x6c4] ss:$24 sps:$4 sm:$0xff]   ;;  %v3260_v46 = vld [vmem:[#allocation9 + $0xf8] ss:$24 sps:$4 sm:$0xff]   ;;  %v125_v8 = vadd.f32 %v124_v2, %v123_v62  ;;  %v161_v9 = vadd.f32 %v160_v3, %v159_v63  ;;  %v154_v18 = vrot.slane %v153_v6, 2 }
  0x93   :  { %2244 = vmatprep.subr.bf16.mxu0 %v3223_v51  ;;  %v3274_v51 = vld [vmem:[#allocation9 + $0x15c] ss:$24 sps:$4 sm:$0xff]   ;;  %v3275_v16 = vld [vmem:[#allocation9 + $0x780] ss:$24 sps:$4 sm:$0xff]  }
  0x94   :  { %v162_v13 = vrot.slane %v161_v9, 1  ;;  %v3284_v22 = vld [vmem:[#allocation9 + $0x1b8] ss:$24 sps:$4 sm:$0xff]   ;;  %v3314_v62 = vld [vmem:[#allocation9 + $0x2a8] ss:$24 sps:$4 sm:$0xff]  }
  0x95   :  { %2204 = vmatpush1.bf16.msra.mxu1 %v3225_v0  ;;  %v3272_v0 = vld [vmem:[#allocation9 + $0x158] ss:$24 sps:$4 sm:$0xff]   ;;  %v3322_v63 = vld [vmem:[#allocation9 + $0x2dc] ss:$24 sps:$4 sm:$0xff]  }
  0x96   :  { %2245 = vmatpush1.bf16.msra.mxu0 %v3226_v1  ;;  %2296 = vmatprep.subr.bf16.mxu1 %v3232_v12  ;;  %v3280_v1 = vld [vmem:[#allocation9 + $0x18c] ss:$24 sps:$4 sm:$0xff]   ;;  %v126_v12 = vrot.slane %v125_v8, 1  ;;  %v3299_v52 = vld [vmem:[#allocation9 + $0x840] ss:$24 sps:$4 sm:$0xff]  }
  0x97   :  { %2255 = vmatprep.subr.bf16.mxu0 %v3229_v11  ;;  %v3286_v11 = vld [vmem:[#allocation9 + $0x1bc] ss:$24 sps:$4 sm:$0xff]   ;;  %v3308_v56 = vld [vmem:[#allocation9 + $0x278] ss:$24 sps:$4 sm:$0xff]  }
  0x98   :  { %2206 = vmatmul.mubr.bf16.vlgmr.msra.gmra.mrb[0].mxu1 %v3876_v24  ;;  %v127_v20 = vadd.f32 %v126_v12, %v125_v8  ;;  %v3319_v3 = vld [vmem:[#allocation9 + $0x8d4] ss:$24 sps:$4 sm:$0xff]   ;;  %v3326_v12 = vld [vmem:[#allocation9 + $0x10] ss:$24 sps:$4 sm:$0xff]  }
  0x99   :  { %2297 = vmatpush1.bf16.msra.mxu1 %v3230_v21  ;;  %2328 = vmatprep.mubr.bf16.mxu1 %v3869_v14  ;;  %v163_v21 = vadd.f32 %v162_v13, %v161_v9  ;;  %v3328_v8 = vld [vmem:[#allocation9 + $0x14] ss:$24 sps:$4 sm:$0xff]   ;;  %v3323_v9 = vld [vmem:[#allocation9 + $0x308] ss:$24 sps:$4 sm:$0xff]   ;;  %v3334_v13 = vld [vmem:[#allocation9 + $0x44] ss:$24 sps:$4 sm:$0xff]  }
  0x9a   :  { %2247 = vmatmul.mubr.bf16.vlgmr.msra.gmra.mrb[0].mxu0 %v3880_v28  ;;  %2298 = vmatprep.subr.bf16.mxu1 %v3238_v25  ;;  %v170_v25 = vmul.f32 0.125, %v127_v20  ;;  %v3335_v20 = vld [vmem:[#allocation9 + $0x368] ss:$24 sps:$4 sm:$0xff]  }
  0x9b   :  { %2256 = vmatpush1.bf16.msra.mxu0 %v3227_v26  ;;  %v176_v26 = vmul.f32 0.125, %v163_v21  ;;  %v3343_v21 = vld [vmem:[#allocation9 + $0x39c] ss:$24 sps:$4 sm:$0xff]  }
  0x9c   :  { %2257 = vmatprep.subr.bf16.mxu0 %v3235_v29  ;;  %v119_v29 = vadd.f32 %v118_v17, %v117_v5  ;;  %v3325_v5 = vld [vmem:[#allocation9 + $0x30c] ss:$24 sps:$4 sm:$0xff]  }
  0x9d   :  { %2299 = vmatpush1.bf16.msra.mxu1 %v3236_v30  ;;  %v155_v30 = vadd.f32 %v154_v18, %v153_v6  ;;  %v3317_v6 = vld [vmem:[#allocation9 + $0x8d0] ss:$24 sps:$4 sm:$0xff]   ;;  %v3337_v17 = vld [vmem:[#allocation9 + $0x36c] ss:$24 sps:$4 sm:$0xff]   ;;  %v3332_v18 = vld [vmem:[#allocation9 + $0x40] ss:$24 sps:$4 sm:$0xff]  }
  0x9e   :  { %2300 = vmatprep.subr.bf16.mxu1 %v3244_v31  ;;  %v3289_v31 = vld [vmem:[#allocation9 + $0x7e4] ss:$24 sps:$4 sm:$0xff]  }
  0x9f   :  { %2258 = vmatpush1.bf16.msra.mxu0 %v3233_v32  ;;  %v364_v32 = vpack.c.bf16 %v170_v25, %v170_v25  ;;  %v3341_v25 = vld [vmem:[#allocation9 + $0x398] ss:$24 sps:$4 sm:$0xff]  }
  0xa0   :  { %2259 = vmatprep.subr.bf16.mxu0 %v3241_v33  ;;  %v370_v33 = vpack.c.bf16 %v176_v26, %v176_v26  ;;  %v3349_v26 = vld [vmem:[#allocation9 + $0x3cc] ss:$24 sps:$4 sm:$0xff]  }
  0xa1   :  { %2301 = vmatpush1.bf16.msra.mxu1 %v3242_v34  ;;  %v3290_v34 = vld [vmem:[#allocation9 + $0x1e8] ss:$24 sps:$4 sm:$0xff]  }
  0xa2   :  { %2302 = vmatprep.subr.bf16.mxu1 %v3250_v35  ;;  %v3298_v35 = vld [vmem:[#allocation9 + $0x21c] ss:$24 sps:$4 sm:$0xff]  }
  0xa3   :  { %2260 = vmatpush1.bf16.msra.mxu0 %v3239_v36  ;;  %v708_v36 = vunpack.c.l.b16 %v364_v32  ;;  %v3358_v32 = vld [vmem:[#allocation9 + $0x104] ss:$24 sps:$4 sm:$0xff]  }
  0xa4   :  { %2261 = vmatprep.subr.bf16.mxu0 %v3247_v37  ;;  %v714_v37 = vunpack.c.l.b16 %v370_v33  ;;  %v3353_v33 = vld [vmem:[#allocation9 + $0x3f8] ss:$24 sps:$4 sm:$0xff]  }
  0xa5   :  { %2303 = vmatpush1.bf16.msra.mxu1 %v3248_v38  ;;  %v3287_v38 = vld [vmem:[#allocation9 + $0x7e0] ss:$24 sps:$4 sm:$0xff]  }
  0xa6   :  { %2304 = vmatprep.subr.bf16.mxu1 %v3256_v39  ;;  %v120_v39 = vrot.slane %v119_v29, 1 }
  0xa7   :  { %2262 = vmatpush1.bf16.msra.mxu0 %v3245_v40  ;;  %v156_v40 = vrot.slane %v155_v30, 1 }
  0xa8   :  { %2263 = vmatprep.subr.bf16.mxu0 %v3253_v41  ;;  %v3295_v41 = vld [vmem:[#allocation9 + $0x814] ss:$24 sps:$4 sm:$0xff]  }
  0xa9   :  { %2305 = vmatpush1.bf16.msra.mxu1 %v3254_v42  ;;  %v720_v42 = vsel %vm340_vm0, %v714_v37, %v708_v36  ;;  %v3364_v36 = vld [vmem:[#allocation9 + $0x134] ss:$24 sps:$4 sm:$0xff]   ;;  %v3359_v37 = vld [vmem:[#allocation9 + $0x428] ss:$24 sps:$4 sm:$0xff]  }
  0xaa   :  { %2306 = vmatprep.subr.bf16.mxu1 %v3262_v43  ;;  %v3296_v43 = vld [vmem:[#allocation9 + $0x218] ss:$24 sps:$4 sm:$0xff]  }
  0xab   :  { %2264 = vmatpush1.bf16.msra.mxu0 %v3251_v44  ;;  %v3885_v44 = vpack.c.b16 %v720_v42, %v720_v42  ;;  %v3373_v42 = vld [vmem:[#allocation9 + $0x48c] ss:$24 sps:$4 sm:$0xff]  }
  0xac   :  { %2265 = vmatprep.subr.bf16.mxu0 %v3259_v45  ;;  %v3304_v45 = vld [vmem:[#allocation9 + $0x24c] ss:$24 sps:$4 sm:$0xff]  }
  0xad   :  { %2307 = vmatpush1.bf16.msra.mxu1 %v3260_v46  ;;  %v3293_v46 = vld [vmem:[#allocation9 + $0x810] ss:$24 sps:$4 sm:$0xff]   ;;  %2287 = vmatprep.mubr.bf16.mxu0 %v3885_v44 }
  0xae   :  { %2308 = vmatprep.subr.bf16.mxu1 %v3268_v47  ;;  %v121_v47 = vadd.f32 %v120_v39, %v119_v29  ;;  %v3352_v29 = vld [vmem:[#allocation9 + $0xd4] ss:$24 sps:$4 sm:$0xff]   ;;  %v3362_v39 = vld [vmem:[#allocation9 + $0x130] ss:$24 sps:$4 sm:$0xff]  }
  0xaf   :  { %2266 = vmatpush1.bf16.msra.mxu0 %v3257_v48  ;;  %v157_v48 = vadd.f32 %v156_v40, %v155_v30  ;;  %v3355_v30 = vld [vmem:[#allocation9 + $0x3fc] ss:$24 sps:$4 sm:$0xff]  }
  0xb0   :  { %2267 = vmatprep.subr.bf16.mxu0 %v3265_v49  ;;  %v3301_v49 = vld [vmem:[#allocation9 + $0x844] ss:$24 sps:$4 sm:$0xff]   ;;  %v169_v53 = vmul.f32 0.125, %v121_v47 }
  0xb1   :  { %2309 = vmatpush1.bf16.msra.mxu1 %v3266_v50  ;;  %v3302_v50 = vld [vmem:[#allocation9 + $0x248] ss:$24 sps:$4 sm:$0xff]   ;;  %v175_v54 = vmul.f32 0.125, %v157_v48  ;;  %v3370_v40 = vld [vmem:[#allocation9 + $0x164] ss:$24 sps:$4 sm:$0xff]  }
  0xb2   :  { %2310 = vmatprep.subr.bf16.mxu1 %v3274_v51  ;;  %v3310_v51 = vld [vmem:[#allocation9 + $0x27c] ss:$24 sps:$4 sm:$0xff]   ;;  %v363_v59 = vpack.c.bf16 %v169_v53, %v169_v53  ;;  %v3374_v48 = vld [vmem:[#allocation9 + $0x190] ss:$24 sps:$4 sm:$0xff]  }
  0xb3   :  { %2268 = vmatpush1.bf16.msra.mxu0 %v3263_v58  ;;  %v3305_v58 = vld [vmem:[#allocation9 + $0x870] ss:$24 sps:$4 sm:$0xff]   ;;  %v369_v60 = vpack.c.bf16 %v175_v54, %v175_v54  ;;  %v3379_v47 = vld [vmem:[#allocation9 + $0x4bc] ss:$24 sps:$4 sm:$0xff]  }
  0xb4   :  { %2269 = vmatprep.subr.bf16.mxu0 %v3271_v61  ;;  %v3313_v61 = vld [vmem:[#allocation9 + $0x8a4] ss:$24 sps:$4 sm:$0xff]   ;;  %v3388_v53 = vld [vmem:[#allocation9 + $0x1f4] ss:$24 sps:$4 sm:$0xff]   ;;  %v3383_v54 = vld [vmem:[#allocation9 + $0x4e8] ss:$24 sps:$4 sm:$0xff]  }
  0xb5   :  { %2311 = vmatpush1.bf16.msra.mxu1 %v3272_v0  ;;  %v3311_v0 = vld [vmem:[#allocation9 + $0x8a0] ss:$24 sps:$4 sm:$0xff]   ;;  %v713_v2 = vunpack.c.l.b16 %v369_v60 }
  0xb6   :  { %2312 = vmatprep.subr.bf16.mxu1 %v3280_v1  ;;  %v707_v1 = vunpack.c.l.b16 %v363_v59  ;;  %v3397_v59 = vld [vmem:[#allocation9 + $0x54c] ss:$24 sps:$4 sm:$0xff]   ;;  %v3392_v60 = vld [vmem:[#allocation9 + $0x220] ss:$24 sps:$4 sm:$0xff]  }
  0xb7   :  { %2270 = vmatpush1.bf16.msra.mxu0 %v3269_v4  ;;  %v3320_v4 = vld [vmem:[#allocation9 + $0x2d8] ss:$24 sps:$4 sm:$0xff]  }
  0xb8   :  { %2271 = vmatprep.subr.bf16.mxu0 %v3277_v7  ;;  %v719_v7 = vsel %vm340_vm0, %v713_v2, %v707_v1  ;;  %v3406_v1 = vld [vmem:[#allocation9 + $0x284] ss:$24 sps:$4 sm:$0xff]   ;;  %v3401_v2 = vld [vmem:[#allocation9 + $0x578] ss:$24 sps:$4 sm:$0xff]  }
  0xb9   :  { %2313 = vmatpush1.bf16.msra.mxu1 %v3278_v10  ;;  %v3889_v10 = vpack.c.b16 %v719_v7, %v719_v7  ;;  %v3415_v7 = vld [vmem:[#allocation9 + $0x5dc] ss:$24 sps:$4 sm:$0xff]  }
  0xba   :  { %2314 = vmatprep.subr.bf16.mxu1 %v3286_v11  ;;  %v3331_v11 = vld [vmem:[#allocation9 + $0x33c] ss:$24 sps:$4 sm:$0xff]  }
  0xbb   :  { %2272 = vmatpush1.bf16.msra.mxu0 %v3275_v16  ;;  %v3329_v16 = vld [vmem:[#allocation9 + $0x338] ss:$24 sps:$4 sm:$0xff]  }
  0xbc   :  { %2273 = vmatprep.subr.bf16.mxu0 %v3283_v19  ;;  %v3340_v19 = vld [vmem:[#allocation9 + $0x74] ss:$24 sps:$4 sm:$0xff]  }
  0xbd   :  { %2315 = vmatpush1.bf16.msra.mxu1 %v3284_v22  ;;  %v3338_v22 = vld [vmem:[#allocation9 + $0x70] ss:$24 sps:$4 sm:$0xff]  }
  0xbe   :  { %2316 = vmatprep.subr.bf16.mxu1 %v3292_v23  ;;  %v3346_v23 = vld [vmem:[#allocation9 + $0xa4] ss:$24 sps:$4 sm:$0xff]  }
  0xbf   :  { %2274 = vmatpush1.bf16.msra.mxu0 %v3281_v27  ;;  %v3344_v27 = vld [vmem:[#allocation9 + $0xa0] ss:$24 sps:$4 sm:$0xff]  }
  0xc0   :  { %2275 = vmatprep.subr.bf16.mxu0 %v3289_v31  ;;  %v3350_v31 = vld [vmem:[#allocation9 + $0xd0] ss:$24 sps:$4 sm:$0xff]  }
  0xc1   :  { %2317 = vmatpush1.bf16.msra.mxu1 %v3290_v34  ;;  %v3361_v34 = vld [vmem:[#allocation9 + $0x42c] ss:$24 sps:$4 sm:$0xff]  }
  0xc2   :  { %2318 = vmatprep.subr.bf16.mxu1 %v3298_v35  ;;  %v3356_v35 = vld [vmem:[#allocation9 + $0x100] ss:$24 sps:$4 sm:$0xff]  }
  0xc3   :  { %2276 = vmatpush1.bf16.msra.mxu0 %v3287_v38  ;;  %v3367_v38 = vld [vmem:[#allocation9 + $0x45c] ss:$24 sps:$4 sm:$0xff]  }
  0xc4   :  { %2277 = vmatprep.subr.bf16.mxu0 %v3295_v41  ;;  %v3365_v41 = vld [vmem:[#allocation9 + $0x458] ss:$24 sps:$4 sm:$0xff]  }
  0xc5   :  { %2319 = vmatpush1.bf16.msra.mxu1 %v3296_v43  ;;  %v3368_v43 = vld [vmem:[#allocation9 + $0x160] ss:$24 sps:$4 sm:$0xff]  }
  0xc6   :  { %2320 = vmatprep.subr.bf16.mxu1 %v3304_v45  ;;  %v3376_v45 = vld [vmem:[#allocation9 + $0x194] ss:$24 sps:$4 sm:$0xff]  }
  0xc7   :  { %2278 = vmatpush1.bf16.msra.mxu0 %v3293_v46  ;;  %v3371_v46 = vld [vmem:[#allocation9 + $0x488] ss:$24 sps:$4 sm:$0xff]  }
  0xc8   :  { %2279 = vmatprep.subr.bf16.mxu0 %v3301_v49  ;;  %v3382_v49 = vld [vmem:[#allocation9 + $0x1c4] ss:$24 sps:$4 sm:$0xff]  }
  0xc9   :  { %2321 = vmatpush1.bf16.msra.mxu1 %v3302_v50  ;;  %v3377_v50 = vld [vmem:[#allocation9 + $0x4b8] ss:$24 sps:$4 sm:$0xff]  }
  0xca   :  { %2322 = vmatprep.subr.bf16.mxu1 %v3310_v51  ;;  %v3385_v51 = vld [vmem:[#allocation9 + $0x4ec] ss:$24 sps:$4 sm:$0xff]  }
  0xcb   :  { %2280 = vmatpush1.bf16.msra.mxu0 %v3299_v52  ;;  %v3380_v52 = vld [vmem:[#allocation9 + $0x1c0] ss:$24 sps:$4 sm:$0xff]  }
  0xcc   :  { %2281 = vmatprep.subr.bf16.mxu0 %v3307_v55  ;;  %v3391_v55 = vld [vmem:[#allocation9 + $0x51c] ss:$24 sps:$4 sm:$0xff]  }
  0xcd   :  { %2323 = vmatpush1.bf16.msra.mxu1 %v3308_v56  ;;  %v3386_v56 = vld [vmem:[#allocation9 + $0x1f0] ss:$24 sps:$4 sm:$0xff]  }
  0xce   :  { %2324 = vmatprep.subr.bf16.mxu1 %v3316_v57  ;;  %v3394_v57 = vld [vmem:[#allocation9 + $0x224] ss:$24 sps:$4 sm:$0xff]  }
  0xcf   :  { %2282 = vmatpush1.bf16.msra.mxu0 %v3305_v58  ;;  %v3389_v58 = vld [vmem:[#allocation9 + $0x518] ss:$24 sps:$4 sm:$0xff]  }
  0xd0   :  { %2283 = vmatprep.subr.bf16.mxu0 %v3313_v61  ;;  %v3400_v61 = vld [vmem:[#allocation9 + $0x254] ss:$24 sps:$4 sm:$0xff]  }
  0xd1   :  { %2325 = vmatpush1.bf16.msra.mxu1 %v3314_v62  ;;  %v3395_v62 = vld [vmem:[#allocation9 + $0x548] ss:$24 sps:$4 sm:$0xff]  }
  0xd2   :  { %2326 = vmatprep.subr.bf16.mxu1 %v3322_v63  ;;  %v3403_v63 = vld [vmem:[#allocation9 + $0x57c] ss:$24 sps:$4 sm:$0xff]  }
  0xd3   :  { %2284 = vmatpush1.bf16.msra.mxu0 %v3311_v0  ;;  %v3398_v0 = vld [vmem:[#allocation9 + $0x250] ss:$24 sps:$4 sm:$0xff]  }
  0xd4   :  { %2285 = vmatprep.subr.bf16.mxu0 %v3319_v3  ;;  %v3409_v3 = vld [vmem:[#allocation9 + $0x5ac] ss:$24 sps:$4 sm:$0xff]  }
  0xd5   :  { %2327 = vmatpush1.bf16.msra.mxu1 %v3320_v4  ;;  %v3404_v4 = vld [vmem:[#allocation9 + $0x280] ss:$24 sps:$4 sm:$0xff]  }
  0xd6   :  { %2337 = vmatprep.subr.bf16.mxu1 %v3325_v5  ;;  %v3412_v5 = vld [vmem:[#allocation9 + $0x2b4] ss:$24 sps:$4 sm:$0xff]  }
  0xd7   :  { %2286 = vmatpush1.bf16.msra.mxu0 %v3317_v6  ;;  %v3407_v6 = vld [vmem:[#allocation9 + $0x5a8] ss:$24 sps:$4 sm:$0xff]  }
  0xd8   :  { %2419 = vmatprep.subr.bf16.mxu0 %v3328_v8  ;;  %2329 = vmatmul.mubr.bf16.vlgmr.msra.gmra.mrb[4].mxu1 %v3876_v24  ;;  %v3410_v8 = vld [vmem:[#allocation9 + $0x2b0] ss:$24 sps:$4 sm:$0xff]  }
  0xd9   :  { %2338 = vmatpush1.bf16.msra.mxu1 %v3323_v9  ;;  %2369 = vmatprep.mubr.bf16.mxu1 %v3871_v15  ;;  %v3418_v9 = vld [vmem:[#allocation9 + $0x2e4] ss:$24 sps:$4 sm:$0xff]  }
  0xda   :  { %2288 = vmatmul.mubr.bf16.vlgmr.msra.gmra.mrb[0].mxu0 %v3889_v10  ;;  %2339 = vmatprep.subr.bf16.mxu1 %v3331_v11  ;;  %v3413_v11 = vld [vmem:[#allocation9 + $0x5d8] ss:$24 sps:$4 sm:$0xff]  }
  0xdb   :  { %2420 = vmatpush1.bf16.msra.mxu0 %v3326_v12  ;;  %2451 = vmatprep.mubr.bf16.mxu0 %v3869_v14  ;;  %v3347_v14 = vld [vmem:[#allocation9 + $0x3c8] ss:$24 sps:$4 sm:$0xff]   ;;  %v3421_v12 = vld [vmem:[#allocation9 + $0x60c] ss:$24 sps:$4 sm:$0xff]  }
  0xdc   :  { %2421 = vmatprep.subr.bf16.mxu0 %v3334_v13  ;;  %v3416_v13 = vld [vmem:[#allocation9 + $0x2e0] ss:$24 sps:$4 sm:$0xff]  }
  0xdd   :  { %2340 = vmatpush1.bf16.msra.mxu1 %v3329_v16  ;;  %v3424_v16 = vld [vmem:[#allocation9 + $0x314] ss:$24 sps:$4 sm:$0xff]  }
  0xde   :  { %2341 = vmatprep.subr.bf16.mxu1 %v3337_v17  ;;  %v3419_v17 = vld [vmem:[#allocation9 + $0x608] ss:$24 sps:$4 sm:$0xff]  }
  0xdf   :  { %2422 = vmatpush1.bf16.msra.mxu0 %v3332_v18  ;;  %v3427_v18 = vld [vmem:[#allocation9 + $0x63c] ss:$24 sps:$4 sm:$0xff]  }
  0xe0   :  { %2423 = vmatprep.subr.bf16.mxu0 %v3340_v19  ;;  %v3422_v19 = vld [vmem:[#allocation9 + $0x310] ss:$24 sps:$4 sm:$0xff]  }
  0xe1   :  { %2342 = vmatpush1.bf16.msra.mxu1 %v3335_v20  ;;  %v3430_v20 = vld [vmem:[#allocation9 + $0x344] ss:$24 sps:$4 sm:$0xff]  }
  0xe2   :  { %2343 = vmatprep.subr.bf16.mxu1 %v3343_v21  ;;  %v3425_v21 = vld [vmem:[#allocation9 + $0x638] ss:$24 sps:$4 sm:$0xff]  }
  0xe3   :  { %2424 = vmatpush1.bf16.msra.mxu0 %v3338_v22  ;;  %v3433_v22 = vld [vmem:[#allocation9 + $0x66c] ss:$24 sps:$4 sm:$0xff]  }
  0xe4   :  { %2425 = vmatprep.subr.bf16.mxu0 %v3346_v23  ;;  %v3428_v23 = vld [vmem:[#allocation9 + $0x340] ss:$24 sps:$4 sm:$0xff]  }
  0xe5   :  { %2344 = vmatpush1.bf16.msra.mxu1 %v3341_v25  ;;  %v3436_v25 = vld [vmem:[#allocation9 + $0x374] ss:$24 sps:$4 sm:$0xff]  }
  0xe6   :  { %2345 = vmatprep.subr.bf16.mxu1 %v3349_v26  ;;  %v3431_v26 = vld [vmem:[#allocation9 + $0x668] ss:$24 sps:$4 sm:$0xff]  }
  0xe7   :  { %2426 = vmatpush1.bf16.msra.mxu0 %v3344_v27  ;;  %v3439_v27 = vld [vmem:[#allocation9 + $0x69c] ss:$24 sps:$4 sm:$0xff]  }
  0xe8   :  { %2427 = vmatprep.subr.bf16.mxu0 %v3352_v29  ;;  %v3434_v29 = vld [vmem:[#allocation9 + $0x370] ss:$24 sps:$4 sm:$0xff]  }
  0xe9   :  { %2346 = vmatpush1.bf16.msra.mxu1 %v3347_v14  ;;  %v3442_v14 = vld [vmem:[#allocation9 + $0x3a4] ss:$24 sps:$4 sm:$0xff]  }
  0xea   :  { %2347 = vmatprep.subr.bf16.mxu1 %v3355_v30  ;;  %v3437_v30 = vld [vmem:[#allocation9 + $0x698] ss:$24 sps:$4 sm:$0xff]  }
  0xeb   :  { %2428 = vmatpush1.bf16.msra.mxu0 %v3350_v31  ;;  %v3440_v31 = vld [vmem:[#allocation9 + $0x3a0] ss:$24 sps:$4 sm:$0xff]  }
  0xec   :  { %2429 = vmatprep.subr.bf16.mxu0 %v3358_v32  ;;  %v3448_v32 = vld [vmem:[#allocation9 + $0x3d4] ss:$24 sps:$4 sm:$0xff]  }
  0xed   :  { %2348 = vmatpush1.bf16.msra.mxu1 %v3353_v33  ;;  %v3451_v33 = vld [vmem:[#allocation9 + $0x6fc] ss:$24 sps:$4 sm:$0xff]  }
  0xee   :  { %2349 = vmatprep.subr.bf16.mxu1 %v3361_v34  ;;  %v3446_v34 = vld [vmem:[#allocation9 + $0x3d0] ss:$24 sps:$4 sm:$0xff]  }
  0xef   :  { %2430 = vmatpush1.bf16.msra.mxu0 %v3356_v35  ;;  %v3454_v35 = vld [vmem:[#allocation9 + $0x404] ss:$24 sps:$4 sm:$0xff]  }
  0xf0   :  { %2431 = vmatprep.subr.bf16.mxu0 %v3364_v36  ;;  %v3449_v36 = vld [vmem:[#allocation9 + $0x6f8] ss:$24 sps:$4 sm:$0xff]  }
  0xf1   :  { %2350 = vmatpush1.bf16.msra.mxu1 %v3359_v37  ;;  %v3457_v37 = vld [vmem:[#allocation9 + $0x72c] ss:$24 sps:$4 sm:$0xff]  }
  0xf2   :  { %2351 = vmatprep.subr.bf16.mxu1 %v3367_v38  ;;  %v3452_v38 = vld [vmem:[#allocation9 + $0x400] ss:$24 sps:$4 sm:$0xff]  }
  0xf3   :  { %2432 = vmatpush1.bf16.msra.mxu0 %v3362_v39  ;;  %v3460_v39 = vld [vmem:[#allocation9 + $0x434] ss:$24 sps:$4 sm:$0xff]  }
  0xf4   :  { %2433 = vmatprep.subr.bf16.mxu0 %v3370_v40  ;;  %v3455_v40 = vld [vmem:[#allocation9 + $0x728] ss:$24 sps:$4 sm:$0xff]  }
  0xf5   :  { %2352 = vmatpush1.bf16.msra.mxu1 %v3365_v41  ;;  %v3463_v41 = vld [vmem:[#allocation9 + $0x75c] ss:$24 sps:$4 sm:$0xff]  }
  0xf6   :  { %2353 = vmatprep.subr.bf16.mxu1 %v3373_v42  ;;  %v3458_v42 = vld [vmem:[#allocation9 + $0x430] ss:$24 sps:$4 sm:$0xff]  }
  0xf7   :  { %2434 = vmatpush1.bf16.msra.mxu0 %v3368_v43  ;;  %v3466_v43 = vld [vmem:[#allocation9 + $0x464] ss:$24 sps:$4 sm:$0xff]  }
  0xf8   :  { %2435 = vmatprep.subr.bf16.mxu0 %v3376_v45  ;;  %v3461_v45 = vld [vmem:[#allocation9 + $0x758] ss:$24 sps:$4 sm:$0xff]  }
  0xf9   :  { %2354 = vmatpush1.bf16.msra.mxu1 %v3371_v46  ;;  %v290_v46 = vlaneseq }
  0xfa   :  { %2355 = vmatprep.subr.bf16.mxu1 %v3379_v47  ;;  %v3469_v47 = vld [vmem:[#allocation9 + $0x78c] ss:$24 sps:$4 sm:$0xff]  }
  0xfb   :  { %2436 = vmatpush1.bf16.msra.mxu0 %v3374_v48  ;;  %v3464_v48 = vld [vmem:[#allocation9 + $0x460] ss:$24 sps:$4 sm:$0xff]  }
  0xfc   :  { %2437 = vmatprep.subr.bf16.mxu0 %v3382_v49  ;;  %v3472_v49 = vld [vmem:[#allocation9 + $0x494] ss:$24 sps:$4 sm:$0xff]  }
  0xfd   :  { %2356 = vmatpush1.bf16.msra.mxu1 %v3377_v50  ;;  %v3467_v50 = vld [vmem:[#allocation9 + $0x788] ss:$24 sps:$4 sm:$0xff]  }
  0xfe   :  { %2357 = vmatprep.subr.bf16.mxu1 %v3385_v51  ;;  %v3899_v51 = vshrl.u32 %v290_v46, 7 }
  0xff   :  { %2438 = vmatpush1.bf16.msra.mxu0 %v3380_v52  ;;  %v3475_v52 = vld [vmem:[#allocation9 + $0x7bc] ss:$24 sps:$4 sm:$0xff]  }
 0x100   :  { %2439 = vmatprep.subr.bf16.mxu0 %v3388_v53  ;;  %v3470_v53 = vld [vmem:[#allocation9 + $0x490] ss:$24 sps:$4 sm:$0xff]   ;;  %vm2546_vm1 = vcmp.eq.s32.totalorder %v3899_v51, 0  ;;  %vm2550_vm2 = vcmp.eq.s32.totalorder %v3899_v51, 1 }
 0x101   :  { %2358 = vmatpush1.bf16.msra.mxu1 %v3383_v54  ;;  %v3478_v54 = vld [vmem:[#allocation9 + $0x4c4] ss:$24 sps:$4 sm:$0xff]  }
 0x102   :  { %2359 = vmatprep.subr.bf16.mxu1 %v3391_v55  ;;  %v2545_v55 = vand.u32 127, %v290_v46  ;;  %v3533_v46 = vld [vmem:[#allocation9 + $0x730] ss:$24 sps:$4 sm:$0xff]  }
 0x103   :  { %2440 = vmatpush1.bf16.msra.mxu0 %v3386_v56  ;;  %v3473_v56 = vld [vmem:[#allocation9 + $0x7b8] ss:$24 sps:$4 sm:$0xff]  }
 0x104   :  { %2441 = vmatprep.subr.bf16.mxu0 %v3394_v57  ;;  %v2548_v57 = vstv %s2547_s4 }
 0x105   :  { %2360 = vmatpush1.bf16.msra.mxu1 %v3389_v58  ;;  %v3481_v58 = vld [vmem:[#allocation9 + $0x7ec] ss:$24 sps:$4 sm:$0xff]  }
 0x106   :  { %2361 = vmatprep.subr.bf16.mxu1 %v3397_v59  ;;  %v2549_v59 = vsel %vm2546_vm1, %v2548_v57, 0  ;;  %v3548_v57 = vld [vmem:[#allocation9 + $0x820] ss:$24 sps:$4 sm:$0xff]  }
 0x107   :  { %2442 = vmatpush1.bf16.msra.mxu0 %v3392_v60  ;;  %v2552_v60 = vstv %s3086_s13 }
 0x108   :  { %2443 = vmatprep.subr.bf16.mxu0 %v3400_v61  ;;  %v3476_v61 = vld [vmem:[#allocation9 + $0x4c0] ss:$24 sps:$4 sm:$0xff]  }
 0x109   :  { %2362 = vmatpush1.bf16.msra.mxu1 %v3395_v62  ;;  %v2553_v62 = vsel %vm2550_vm2, %v2552_v60, %v2549_v59  ;;  %v3551_v59 = vld [vmem:[#allocation9 + $0x850] ss:$24 sps:$4 sm:$0xff]   ;;  %v3556_v60 = vld [vmem:[#allocation9 + $0x884] ss:$24 sps:$4 sm:$0xff]  }
 0x10a   :  { %2363 = vmatprep.subr.bf16.mxu1 %v3403_v63  ;;  %v3484_v63 = vld [vmem:[#allocation9 + $0x4f4] ss:$24 sps:$4 sm:$0xff]   ;;  %vm2554_vm3 = vcmp.lt.s32.totalorder %v2545_v55, %v2553_v62  ;;  %v3545_v55 = vld [vmem:[#allocation9 + $0x7f0] ss:$24 sps:$4 sm:$0xff]  }
 0x10b   :  { %2444 = vmatpush1.bf16.msra.mxu0 %v3398_v0  ;;  %v3904_v0 = vsub.s32 0, %v3899_v51  ;;  %v3559_v62 = vld [vmem:[#allocation9 + $0x8b4] ss:$24 sps:$4 sm:$0xff]  }
 0x10c   :  { %2445 = vmatprep.subr.bf16.mxu0 %v3406_v1  ;;  %v3907_v1 = vsub.s32 1, %v3899_v51 }
 0x10d   :  { %2364 = vmatpush1.bf16.msra.mxu1 %v3401_v2  ;;  %v3479_v2 = vld [vmem:[#allocation9 + $0x7e8] ss:$24 sps:$4 sm:$0xff]  }
 0x10e   :  { %2365 = vmatprep.subr.bf16.mxu1 %v3409_v3  ;;  %v3748_v3 = vmov 0.0  }
 0x10f   :  { %2446 = vmatpush1.bf16.msra.mxu0 %v3404_v4  ;;  %v3909_v4 = vsel %vm2554_vm3, 1.0, %v3748_v3  ;;  %v3560_v3 = vld [vmem:[#allocation9 + $0x8e0] ss:$24 sps:$4 sm:$0xff]  }
 0x110   :  { %2447 = vmatprep.subr.bf16.mxu0 %v3412_v5  ;;  %v3487_v5 = vld [vmem:[#allocation9 + $0x81c] ss:$24 sps:$4 sm:$0xff]   ;;  %2558 = vst.msk [vmem:[#allocation13] sm:$0x3] %vm2557_vm4, %v3909_v4 }
 0x111   :  { %2366 = vmatpush1.bf16.msra.mxu1 %v3407_v6  ;;  %v2562_v6 = vrot.slane %v3909_v4, %v3904_v0 }
 0x112   :  { %2367 = vmatprep.subr.bf16.mxu1 %v3415_v7  ;;  %v2573_v7 = vrot.slane %v3909_v4, %v3907_v1 }
 0x113   :  { %2448 = vmatpush1.bf16.msra.mxu0 %v3410_v8  ;;  %v3482_v8 = vld [vmem:[#allocation9 + $0x4f0] ss:$24 sps:$4 sm:$0xff]   ;;  %2564 = vbcast.lane.b32.xlu0 %v2562_v6, 256 }
 0x114   :  { %2449 = vmatprep.subr.bf16.mxu0 %v3418_v9  ;;  %v3490_v9 = vld [vmem:[#allocation9 + $0x524] ss:$24 sps:$4 sm:$0xff]   ;;  %2575 = vbcast.lane.b32.xlu1 %v2573_v7, 256 }
 0x115   :  { %2368 = vmatpush1.bf16.msra.mxu1 %v3413_v11  ;;  %v3485_v11 = vld [vmem:[#allocation9 + $0x818] ss:$24 sps:$4 sm:$0xff]  }
 0x116   :  { %2378 = vmatprep.subr.bf16.mxu1 %v3421_v12  ;;  %v3493_v12 = vld [vmem:[#allocation9 + $0x84c] ss:$24 sps:$4 sm:$0xff]  }
 0x117   :  { %2450 = vmatpush1.bf16.msra.mxu0 %v3416_v13  ;;  %v3488_v13 = vld [vmem:[#allocation9 + $0x520] ss:$24 sps:$4 sm:$0xff]   ;;  %2568 = vbcast.lane.b32.xlu0 %v2562_v6, 264 }
 0x118   :  { %2460 = vmatprep.subr.bf16.mxu0 %v3424_v16  ;;  %2370 = vmatmul.mubr.bf16.vlgmr.msra.gmra.mrb[4].mxu1 %v3880_v28  ;;  %v3496_v16 = vld [vmem:[#allocation9 + $0x554] ss:$24 sps:$4 sm:$0xff]  }
 0x119   :  { %2379 = vmatpush1.bf16.msra.mxu1 %v3419_v17  ;;  %2410 = vmatprep.mubr.bf16.mxu1 %v3885_v44  ;;  %v3491_v17 = vld [vmem:[#allocation9 + $0x848] ss:$24 sps:$4 sm:$0xff]  }
 0x11a   :  { %2452 = vmatmul.mubr.bf16.vlgmr.msra.gmra.mrb[4].mxu0 %v3876_v24  ;;  %2380 = vmatprep.subr.bf16.mxu1 %v3427_v18  ;;  %v3445_v24 = vld [vmem:[#allocation9 + $0x6cc] ss:$24 sps:$4 sm:$0xff]   ;;  %v3499_v18 = vld [vmem:[#allocation9 + $0x87c] ss:$24 sps:$4 sm:$0xff]  }
 0x11b   :  { %2461 = vmatpush1.bf16.msra.mxu0 %v3422_v19  ;;  %2492 = vmatprep.mubr.bf16.mxu0 %v3871_v15  ;;  %v3443_v15 = vld [vmem:[#allocation9 + $0x6c8] ss:$24 sps:$4 sm:$0xff]  }
 0x11c   :  { %2462 = vmatprep.subr.bf16.mxu0 %v3430_v20  ;;  %2579 = vbcast.lane.b32.xlu1 %v2573_v7, 264  ;;  %v3494_v19 = vld [vmem:[#allocation9 + $0x550] ss:$24 sps:$4 sm:$0xff]   ;;  %v3502_v20 = vld [vmem:[#allocation9 + $0x584] ss:$24 sps:$4 sm:$0xff]  }
 0x11d   :  { %2381 = vmatpush1.bf16.msra.mxu1 %v3425_v21  ;;  %v3497_v21 = vld [vmem:[#allocation9 + $0x878] ss:$24 sps:$4 sm:$0xff]  }
 0x11e   :  { %2382 = vmatprep.subr.bf16.mxu1 %v3433_v22  ;;  %v3505_v22 = vld [vmem:[#allocation9 + $0x8ac] ss:$24 sps:$4 sm:$0xff]  }
 0x11f   :  { %2463 = vmatpush1.bf16.msra.mxu0 %v3428_v23  ;;  %v3500_v23 = vld [vmem:[#allocation9 + $0x580] ss:$24 sps:$4 sm:$0xff]  }
 0x120   :  { %2464 = vmatprep.subr.bf16.mxu0 %v3436_v25  ;;  %v3508_v25 = vld [vmem:[#allocation9 + $0x5b4] ss:$24 sps:$4 sm:$0xff]  }
 0x121   :  { %2383 = vmatpush1.bf16.msra.mxu1 %v3431_v26  ;;  %v3503_v26 = vld [vmem:[#allocation9 + $0x8a8] ss:$24 sps:$4 sm:$0xff]  }
 0x122   :  { %2384 = vmatprep.subr.bf16.mxu1 %v3439_v27  ;;  %v3511_v27 = vld [vmem:[#allocation9 + $0x8dc] ss:$24 sps:$4 sm:$0xff]  }
 0x123   :  { %2465 = vmatpush1.bf16.msra.mxu0 %v3434_v29  ;;  %v3506_v29 = vld [vmem:[#allocation9 + $0x5b0] ss:$24 sps:$4 sm:$0xff]  }
 0x124   :  { %2466 = vmatprep.subr.bf16.mxu0 %v3442_v14  ;;  %v3514_v14 = vld [vmem:[#allocation9 + $0x5e4] ss:$24 sps:$4 sm:$0xff]  }
 0x125   :  { %2385 = vmatpush1.bf16.msra.mxu1 %v3437_v30  ;;  %v3509_v30 = vld [vmem:[#allocation9 + $0x8d8] ss:$24 sps:$4 sm:$0xff]  }
 0x126   :  { %2386 = vmatprep.subr.bf16.mxu1 %v3445_v24  ;;  %v3512_v24 = vld [vmem:[#allocation9 + $0x5e0] ss:$24 sps:$4 sm:$0xff]  }
 0x127   :  { %2467 = vmatpush1.bf16.msra.mxu0 %v3440_v31  ;;  %v3517_v31 = vld [vmem:[#allocation9 + $0x614] ss:$24 sps:$4 sm:$0xff]  }
 0x128   :  { %2468 = vmatprep.subr.bf16.mxu0 %v3448_v32  ;;  %v3515_v32 = vld [vmem:[#allocation9 + $0x610] ss:$24 sps:$4 sm:$0xff]  }
 0x129   :  { %2387 = vmatpush1.bf16.msra.mxu1 %v3443_v15  ;;  %v3520_v15 = vld [vmem:[#allocation9 + $0x644] ss:$24 sps:$4 sm:$0xff]  }
 0x12a   :  { %2388 = vmatprep.subr.bf16.mxu1 %v3451_v33  ;;  %v3518_v33 = vld [vmem:[#allocation9 + $0x640] ss:$24 sps:$4 sm:$0xff]  }
 0x12b   :  { %2469 = vmatpush1.bf16.msra.mxu0 %v3446_v34  ;;  %v3523_v34 = vld [vmem:[#allocation9 + $0x674] ss:$24 sps:$4 sm:$0xff]  }
 0x12c   :  { %2470 = vmatprep.subr.bf16.mxu0 %v3454_v35  ;;  %v3521_v35 = vld [vmem:[#allocation9 + $0x670] ss:$24 sps:$4 sm:$0xff]  }
 0x12d   :  { %2389 = vmatpush1.bf16.msra.mxu1 %v3449_v36  ;;  %v3526_v36 = vld [vmem:[#allocation9 + $0x6a4] ss:$24 sps:$4 sm:$0xff]  }
 0x12e   :  { %2390 = vmatprep.subr.bf16.mxu1 %v3457_v37  ;;  %v3524_v37 = vld [vmem:[#allocation9 + $0x6a0] ss:$24 sps:$4 sm:$0xff]  }
 0x12f   :  { %2471 = vmatpush1.bf16.msra.mxu0 %v3452_v38  ;;  %v3529_v38 = vld [vmem:[#allocation9 + $0x6d4] ss:$24 sps:$4 sm:$0xff]  }
 0x130   :  { %2472 = vmatprep.subr.bf16.mxu0 %v3460_v39  ;;  %v3527_v39 = vld [vmem:[#allocation9 + $0x6d0] ss:$24 sps:$4 sm:$0xff]  }
 0x131   :  { %2391 = vmatpush1.bf16.msra.mxu1 %v3455_v40  ;;  %v3532_v40 = vld [vmem:[#allocation9 + $0x704] ss:$24 sps:$4 sm:$0xff]  }
 0x132   :  { %2392 = vmatprep.subr.bf16.mxu1 %v3463_v41 }
 0x133   :  { %2473 = vmatpush1.bf16.msra.mxu0 %v3458_v42  ;;  %v3535_v42 = vld [vmem:[#allocation9 + $0x734] ss:$24 sps:$4 sm:$0xff]  }
 0x134   :  { %2474 = vmatprep.subr.bf16.mxu0 %v3466_v43 }
 0x135   :  { %2393 = vmatpush1.bf16.msra.mxu1 %v3461_v45 }
 0x136   :  { %2394 = vmatprep.subr.bf16.mxu1 %v3469_v47  ;;  %v3538_v47 = vld [vmem:[#allocation9 + $0x764] ss:$24 sps:$4 sm:$0xff]  }
 0x137   :  { %2475 = vmatpush1.bf16.msra.mxu0 %v3464_v48  ;;  %v3536_v48 = vld [vmem:[#allocation9 + $0x760] ss:$24 sps:$4 sm:$0xff]  }
 0x138   :  { %2476 = vmatprep.subr.bf16.mxu0 %v3472_v49  ;;  %v3541_v49 = vld [vmem:[#allocation9 + $0x794] ss:$24 sps:$4 sm:$0xff]  }
 0x139   :  { %2395 = vmatpush1.bf16.msra.mxu1 %v3467_v50  ;;  %v3539_v50 = vld [vmem:[#allocation9 + $0x790] ss:$24 sps:$4 sm:$0xff]  }
 0x13a   :  { %2396 = vmatprep.subr.bf16.mxu1 %v3475_v52  ;;  %v3544_v52 = vld [vmem:[#allocation9 + $0x7c4] ss:$24 sps:$4 sm:$0xff]  }
 0x13b   :  { %2477 = vmatpush1.bf16.msra.mxu0 %v3470_v53  ;;  %v3542_v53 = vld [vmem:[#allocation9 + $0x7c0] ss:$24 sps:$4 sm:$0xff]  }
 0x13c   :  { %2478 = vmatprep.subr.bf16.mxu0 %v3478_v54  ;;  %v3547_v54 = vld [vmem:[#allocation9 + $0x7f4] ss:$24 sps:$4 sm:$0xff]  }
 0x13d   :  { %2397 = vmatpush1.bf16.msra.mxu1 %v3473_v56  ;;  %v3550_v56 = vld [vmem:[#allocation9 + $0x824] ss:$24 sps:$4 sm:$0xff]  }
 0x13e   :  { %2398 = vmatprep.subr.bf16.mxu1 %v3481_v58  ;;  %v3553_v58 = vld [vmem:[#allocation9 + $0x854] ss:$24 sps:$4 sm:$0xff]  }
 0x13f   :  { %2479 = vmatpush1.bf16.msra.mxu0 %v3476_v61  ;;  %v3554_v61 = vld [vmem:[#allocation9 + $0x880] ss:$24 sps:$4 sm:$0xff]  }
 0x140   :  { %2480 = vmatprep.subr.bf16.mxu0 %v3484_v63  ;;  %v3557_v63 = vld [vmem:[#allocation9 + $0x8b0] ss:$24 sps:$4 sm:$0xff]  }
 0x141   :  { %2399 = vmatpush1.bf16.msra.mxu1 %v3479_v2  ;;  %v3562_v2 = vld [vmem:[#allocation9 + $0x8e4] ss:$24 sps:$4 sm:$0xff]  }
 0x142   :  { %2400 = vmatprep.subr.bf16.mxu1 %v3487_v5  ;;  %v3919_v5 = vld [vmem:[#allocation10] sm:$0x3f] }
 0x143   :  { %2481 = vmatpush1.bf16.msra.mxu0 %v3482_v8  ;;  %v664_v6 = vrot.slane %v3919_v5, %v3904_v0  ;;  %v668_v7 = vrot.slane %v3919_v5, %v3907_v1 }
 0x144   :  { %2482 = vmatprep.subr.bf16.mxu0 %v3490_v9 }
 0x145   :  { %2401 = vmatpush1.bf16.msra.mxu1 %v3485_v11 }
 0x146   :  { %2402 = vmatprep.subr.bf16.mxu1 %v3493_v12 }
 0x147   :  { %2483 = vmatpush1.bf16.msra.mxu0 %v3488_v13 }
 0x148   :  { %2484 = vmatprep.subr.bf16.mxu0 %v3496_v16 }
 0x149   :  { %2403 = vmatpush1.bf16.msra.mxu1 %v3491_v17 }
 0x14a   :  { %2404 = vmatprep.subr.bf16.mxu1 %v3499_v18 }
 0x14b   :  { %2485 = vmatpush1.bf16.msra.mxu0 %v3494_v19  ;;  %v183_v19 = vld [vmem:[#allocation7 + $0x30] sm:$0xff] }
 0x14c   :  { %2486 = vmatprep.subr.bf16.mxu0 %v3502_v20  ;;  %v184_v20 = vld [vmem:[#allocation7 + $0x38] sm:$0xff] }
 0x14d   :  { %2405 = vmatpush1.bf16.msra.mxu1 %v3497_v21  ;;  %v185_v21 = vld [vmem:[#allocation7 + $0x40] sm:$0xff] }
 0x14e   :  { %2406 = vmatprep.subr.bf16.mxu1 %v3505_v22  ;;  %v225_v22 = vrot.slane %v183_v19, 4 }
 0x14f   :  { %2487 = vmatpush1.bf16.msra.mxu0 %v3500_v23  ;;  %v231_v23 = vrot.slane %v184_v20, 4 }
 0x150   :  { %2488 = vmatprep.subr.bf16.mxu0 %v3508_v25  ;;  %v177_v25 = vld [vmem:[#allocation7] sm:$0xff] }
 0x151   :  { %2407 = vmatpush1.bf16.msra.mxu1 %v3503_v26  ;;  %v178_v26 = vld [vmem:[#allocation7 + $0x8] sm:$0xff] }
 0x152   :  { %2408 = vmatprep.subr.bf16.mxu1 %v3511_v27  ;;  %v179_v27 = vld [vmem:[#allocation7 + $0x10] sm:$0xff] }
 0x153   :  { %2489 = vmatpush1.bf16.msra.mxu0 %v3506_v29  ;;  %v180_v29 = vld [vmem:[#allocation7 + $0x18] sm:$0xff] }
 0x154   :  { %2490 = vmatprep.subr.bf16.mxu0 %v3514_v14  ;;  %v189_v14 = vrot.slane %v177_v25, 4 }
 0x155   :  { %2409 = vmatpush1.bf16.msra.mxu1 %v3509_v30  ;;  %v195_v30 = vrot.slane %v178_v26, 4 }
 0x157   :  { %2491 = vmatpush1.bf16.msra.mxu0 %v3512_v24  ;;  %v201_v24 = vrot.slane %v179_v27, 4 }
 0x158   :  { %2411 = vmatmul.mubr.bf16.vlgmr.msra.gmra.mrb[4].mxu1 %v3889_v10  ;;  %2501 = vmatprep.subr.bf16.mxu0 %v3517_v31  ;;  %v226_v31 = vadd.f32 %v225_v22, %v183_v19 }
 0x15a   :  { %2493 = vmatmul.mubr.bf16.vlgmr.msra.gmra.mrb[4].mxu0 %v3880_v28  ;;  %v3530_v28 = vld [vmem:[#allocation9 + $0x700] ss:$24 sps:$4 sm:$0xff]  }
 0x15b   :  { %2502 = vmatpush1.bf16.msra.mxu0 %v3515_v32  ;;  %2533 = vmatprep.mubr.bf16.mxu0 %v3885_v44  ;;  %v181_v32 = vld [vmem:[#allocation7 + $0x20] sm:$0xff] }
 0x15c   :  { %2503 = vmatprep.subr.bf16.mxu0 %v3520_v15  ;;  %v182_v15 = vld [vmem:[#allocation7 + $0x28] sm:$0xff] }
 0x15f   :  { %2504 = vmatpush1.bf16.msra.mxu0 %v3518_v33  ;;  %v207_v33 = vrot.slane %v180_v29, 4 }
 0x160   :  { %2505 = vmatprep.subr.bf16.mxu0 %v3523_v34  ;;  %v232_v34 = vadd.f32 %v231_v23, %v184_v20 }
 0x163   :  { %2506 = vmatpush1.bf16.msra.mxu0 %v3521_v35  ;;  %v237_v35 = vrot.slane %v185_v21, 4 }
 0x164   :  { %2507 = vmatprep.subr.bf16.mxu0 %v3526_v36  ;;  %v190_v36 = vadd.f32 %v189_v14, %v177_v25 }
 0x167   :  { %2508 = vmatpush1.bf16.msra.mxu0 %v3524_v37  ;;  %v196_v37 = vadd.f32 %v195_v30, %v178_v26 }
 0x168   :  { %2509 = vmatprep.subr.bf16.mxu0 %v3529_v38  ;;  %v202_v38 = vadd.f32 %v201_v24, %v179_v27 }
 0x16b   :  { %2510 = vmatpush1.bf16.msra.mxu0 %v3527_v39  ;;  %v2207_v41 = vpop.f32.mrb[0].mxu1  ;;  %v213_v39 = vrot.slane %v181_v32, 4 }
 0x16c   :  { %2511 = vmatprep.subr.bf16.mxu0 %v3532_v40  ;;  %v2209_v44 = vpop.f32.mrb[1].mxu1  ;;  %v2208_v8 = vadd.f32 %v2207_v41, %v664_v6  ;;  %v208_v40 = vadd.f32 %v207_v33, %v180_v29  ;;  %v227_v41 = vrot.slane %v226_v31, 2  ;;  %v188_v6 = vld [vmem:[#allocation7 + $0x58] sm:$0xff] }
 0x16d   :  { %v2211_v43 = vpop.f32.mrb[2].mxu1  ;;  %v2210_v9 = vadd.f32 %v2209_v44, %v668_v7  ;;  %v186_v44 = vld [vmem:[#allocation7 + $0x48] sm:$0xff]  ;;  %v255_v26 = vrot.slane %v188_v6, 4 }
 0x16e   :  { %v2212_v45 = vpop.f32.mrb[3].mxu1  ;;  %v191_v43 = vrot.slane %v190_v36, 2 }
 0x16f   :  { %2512 = vmatpush1.bf16.msra.mxu0 %v3530_v28  ;;  %v219_v28 = vrot.slane %v182_v15, 4  ;;  %v197_v45 = vrot.slane %v196_v37, 2 }
 0x170   :  { %2513 = vmatprep.subr.bf16.mxu0 %v3535_v42  ;;  %v233_v42 = vrot.slane %v232_v34, 2 }
 0x173   :  { %2514 = vmatpush1.bf16.msra.mxu0 %v3533_v46  ;;  %v203_v46 = vrot.slane %v202_v38, 2 }
 0x174   :  { %2515 = vmatprep.subr.bf16.mxu0 %v3538_v47  ;;  %v214_v47 = vadd.f32 %v213_v39, %v181_v32  ;;  %v256_v32 = vadd.f32 %v255_v26, %v188_v6 }
 0x177   :  { %2516 = vmatpush1.bf16.msra.mxu0 %v3536_v48  ;;  %v209_v48 = vrot.slane %v208_v40, 2 }
 0x178   :  { %2517 = vmatprep.subr.bf16.mxu0 %v3541_v49  ;;  %v220_v49 = vadd.f32 %v219_v28, %v182_v15 }
 0x17b   :  { %2518 = vmatpush1.bf16.msra.mxu0 %v3539_v50  ;;  %v228_v50 = vadd.f32 %v227_v41, %v226_v31 }
 0x17c   :  { %2519 = vmatprep.subr.bf16.mxu0 %v3544_v52  ;;  %v234_v52 = vadd.f32 %v233_v42, %v232_v34 }
 0x17f   :  { %2520 = vmatpush1.bf16.msra.mxu0 %v3542_v53  ;;  %v192_v53 = vadd.f32 %v191_v43, %v190_v36 }
 0x180   :  { %2521 = vmatprep.subr.bf16.mxu0 %v3547_v54  ;;  %v198_v54 = vadd.f32 %v197_v45, %v196_v37 }
 0x183   :  { %2522 = vmatpush1.bf16.msra.mxu0 %v3545_v55  ;;  %v204_v55 = vadd.f32 %v203_v46, %v202_v38  ;;  %v257_v38 = vrot.slane %v256_v32, 2 }
 0x184   :  { %2523 = vmatprep.subr.bf16.mxu0 %v3550_v56  ;;  %v215_v56 = vrot.slane %v214_v47, 2 }
 0x185   :  { %v258_v45 = vadd.f32 %v257_v38, %v256_v32 }
 0x187   :  { %2524 = vmatpush1.bf16.msra.mxu0 %v3548_v57  ;;  %v210_v57 = vadd.f32 %v209_v48, %v208_v40 }
 0x188   :  { %2525 = vmatprep.subr.bf16.mxu0 %v3553_v58  ;;  %v221_v58 = vrot.slane %v220_v49, 2 }
 0x189   :  { %v211_v7 = vrot.slane %v210_v57, 1 }
 0x18b   :  { %2526 = vmatpush1.bf16.msra.mxu0 %v3551_v59  ;;  %v238_v59 = vadd.f32 %v237_v35, %v185_v21  ;;  %v212_v25 = vadd.f32 %v211_v7, %v210_v57 }
 0x18c   :  { %2527 = vmatprep.subr.bf16.mxu0 %v3556_v60  ;;  %v243_v60 = vrot.slane %v186_v44, 4 }
 0x18d   :  { %v239_v20 = vrot.slane %v238_v59, 2  ;;  %v264_v40 = vmul.f32 0.125, %v212_v25 }
 0x18e   :  { %v244_v22 = vadd.f32 %v243_v60, %v186_v44 }
 0x18f   :  { %2528 = vmatpush1.bf16.msra.mxu0 %v3554_v61  ;;  %v193_v61 = vrot.slane %v192_v53, 1  ;;  %v240_v14 = vadd.f32 %v239_v20, %v238_v59 }
 0x190   :  { %2529 = vmatprep.subr.bf16.mxu0 %v3559_v62  ;;  %v199_v62 = vrot.slane %v198_v54, 1  ;;  %v245_v30 = vrot.slane %v244_v22, 2 }
 0x191   :  { %v241_v34 = vrot.slane %v240_v14, 1 }
 0x192   :  { %v246_v35 = vadd.f32 %v245_v30, %v244_v22 }
 0x193   :  { %2530 = vmatpush1.bf16.msra.mxu0 %v3557_v63  ;;  %v205_v63 = vrot.slane %v204_v55, 1  ;;  %v242_v28 = vadd.f32 %v241_v34, %v240_v14 }
 0x194   :  { %2531 = vmatprep.subr.bf16.mxu0 %v3562_v2  ;;  %v216_v2 = vadd.f32 %v215_v56, %v214_v47  ;;  %v247_v41 = vrot.slane %v246_v35, 1 }
 0x195   :  { %v206_v23 = vadd.f32 %v205_v63, %v204_v55  ;;  %v269_v48 = vmul.f32 0.125, %v242_v28 }
 0x196   :  { %v248_v46 = vadd.f32 %v247_v41, %v246_v35 }
 0x197   :  { %2532 = vmatpush1.bf16.msra.mxu0 %v3560_v3  ;;  %v187_v3 = vld [vmem:[#allocation7 + $0x50] sm:$0xff]  ;;  %v263_v39 = vmul.f32 0.125, %v206_v23 }
 0x198   :  { %v249_v21 = vrot.slane %v187_v3, 4  ;;  %v270_v56 = vmul.f32 0.125, %v248_v46 }
 0x199   :  { %v286_v57 = vcombine.low %v263_v39, %v264_v40 }
 0x19a   :  { %2534 = vmatmul.mubr.bf16.vlgmr.msra.gmra.mrb[4].mxu0 %v3889_v10  ;;  %v250_v31 = vadd.f32 %v249_v21, %v187_v3  ;;  %v311_v63 = vcombine.low %v269_v48, %v270_v56 }
 0x19c   :  { %v251_v37 = vrot.slane %v250_v31, 2 }
 0x19e   :  { %v252_v43 = vadd.f32 %v251_v37, %v250_v31 }
 0x1ad   :  { %v2289_v11 = vpop.f32.mrb[0].mxu0 }
 0x1ae   :  { %v3925_v12 = vadd.f32 %v2289_v11, %v2208_v8  ;;  %v2291_v13 = vpop.f32.mrb[1].mxu0  ;;  %v222_v8 = vadd.f32 %v221_v58, %v220_v49  ;;  %v235_v11 = vrot.slane %v234_v52, 1  ;;  %v3749_v49 = vmov 1983009808  }
 0x1af   :  { %v3927_v16 = vadd.f32 %v2291_v13, %v2210_v9  ;;  %v2293_v17 = vpop.f32.mrb[2].mxu0  ;;  %v229_v9 = vrot.slane %v228_v50, 1  ;;  %v194_v13 = vadd.f32 %v193_v61, %v192_v53  ;;  %v259_v53 = vrot.slane %v258_v45, 1 }
 0x1b0   :  { %v2294_v18 = vpop.f32.mrb[3].mxu0  ;;  %v217_v17 = vrot.slane %v216_v2, 1  ;;  %v223_v19 = vrot.slane %v222_v8, 1  ;;  %v236_v29 = vadd.f32 %v235_v11, %v234_v52  ;;  %v253_v52 = vrot.slane %v252_v43, 1 }
 0x1b1   :  { %v2587_v10 = vcombine.low %v3925_v12, %v3927_v16  ;;  %v200_v18 = vadd.f32 %v199_v62, %v198_v54  ;;  %v230_v27 = vadd.f32 %v229_v9, %v228_v50  ;;  %v261_v15 = vmul.f32 0.125, %v194_v13 }
 0x1b2   :  { %v218_v24 = vadd.f32 %v217_v17, %v216_v2  ;;  %v224_v33 = vadd.f32 %v223_v19, %v222_v8  ;;  %v268_v44 = vmul.f32 0.125, %v236_v29  ;;  %v288_v50 = vunpack.c.l.s4 %v3749_v49 }
 0x1b3   :  { %v262_v36 = vmul.f32 0.125, %v200_v18  ;;  %v267_v42 = vmul.f32 0.125, %v230_v27  ;;  %v254_v60 = vadd.f32 %v253_v52, %v252_v43  ;;  %v260_v61 = vadd.f32 %v259_v53, %v258_v45 }
 0x1b4   :  { %v265_v47 = vmul.f32 0.125, %v218_v24  ;;  %v266_v54 = vmul.f32 0.125, %v224_v33  ;;  %v289_v58 = vunpack.c.0.s8 %v288_v50 }
 0x1b5   :  { %v285_v55 = vcombine.low %v261_v15, %v262_v36  ;;  %v310_v59 = vcombine.low %v267_v42, %v268_v44 }
 0x1b6   :  { %v292_v62 = vsub.s32 %v289_v58, %v3899_v51 }
 0x1b7   :  { %3672 = shalt.err (!%p3669_p11)
}
 0x1b8   :  { %s3673_s19 = scalar_lea.hbm %s4006_s6, 32 }
 0x1b9   :  { %p3674_p12 = scmp.ne.s32.totalorder %s4006_s6, %s3673_s19  ;;  %p3677_p13 = scmp.lt.u32.totalorder %s3673_s19, %s4006_s6 }
 0x1bb   :  { %p3679_p0 = pnand %p3677_p13, %p3674_p12 }
 0x1bd   :  { %3682 = shalt.err (!%p3679_p0)
}
 0x1be   :  { %2773 = dma.vmem_to_hbm [thread:$0]  %s2771_s16, 32, %s4006_s6, [#allocation14]   ;;  %v271_v4 = vmul.f32 0.125, %v254_v60  ;;  %v272_v2 = vmul.f32 0.125, %v260_v61  ;;  %v302_v3 = vcombine.low %v265_v47, %v266_v54  ;;  %v293_v6 = vrot.slane %v285_v55, %v292_v62 }
 0x1bf   :  { %v300_v7 = vrot.slane %v286_v57, %v292_v62  ;;  %v318_v8 = vrot.slane %v310_v59, %v292_v62  ;;  %v325_v9 = vrot.slane %v311_v63, %v292_v62  ;;  %vm342_vm5 = vcmask 1043459   ;;  %s3751_s26 = smov [#allocation15]  }
 0x1c0   :  { %v327_v11 = vcombine.low %v271_v4, %v272_v2  ;;  %v309_v17 = vrot.slane %v302_v3, %v292_v62  ;;  %vm344_vm6 = vcmask 1045509   ;;  %s2780_s27 = sshll.u32 %s3751_s26, 4  ;;  %vm346_vm7 = vcmask 1047559   ;;  %s2781_s27 = int_to_ptr.vmem [resolvable:$true] %s2780_s27 }
 0x1c1   :  { %v301_v13 = vcombine.low %v293_v6, %v300_v7  ;;  %v326_v18 = vcombine.low %v318_v8, %v325_v9  ;;  %s3683_s6 = scalar_lea.vmem %s2781_s27, 192  ;;  %p3688_p2 = scmp.lt.s32.totalorder %s2781_s27, %s2781_s27 }
 0x1c2   :  { %v334_v19 = vrot.slane %v327_v11, %v292_v62  ;;  %p3684_p1 = scmp.ne.s32.totalorder %s2781_s27, %s3683_s6  ;;  %p3689_p3 = scmp.lt.s32.totalorder %s3683_s6, %s3683_s6 }
 0x1c3   :  { %v339_v20 = vrot.slane %v326_v18, 7 }
 0x1c4   :  { %v350_v22 = vrot.slane %v334_v19, 7  ;;  %p3690_p4 = por %p3689_p3, %p3688_p2 }
 0x1c5   :  { %v341_v23 = vsel %vm340_vm0, %v339_v20, %v301_v13 }
 0x1c6   :  { %v351_v25 = vsel %vm340_vm0, %v350_v22, %v309_v17  ;;  %v343_v21 = vsel %vm342_vm5, %v339_v20, %v341_v23  ;;  %p3691_p5 = pnand %p3690_p4, %p3684_p1 }
 0x1c7   :  { %v352_v26 = vsel %vm342_vm5, %v350_v22, %v351_v25  ;;  %v345_v27 = vsel %vm344_vm6, %v339_v20, %v343_v21 }
 0x1c8   :  { %v353_v29 = vsel %vm344_vm6, %v350_v22, %v352_v26  ;;  %v347_v14 = vsel %vm346_vm7, %v339_v20, %v345_v27 }
 0x1c9   :  { %v354_v30 = vsel %vm346_vm7, %v350_v22, %v353_v29  ;;  %357 = vst [vmem:[#allocation15] sm:$0xff] %v347_v14 }
 0x1ca   :  { %358 = vst [vmem:[#allocation15 + $0x8] sm:$0xf] %v354_v30 }
 0x1cb   :  { %3694 = shalt.err (!%p3691_p5)
}
 0x1cc   :  { %s3695_s30 = scalar_lea.hbm %s4007_s7, 192 }
 0x1cd   :  { %p3696_p6 = scmp.ne.s32.totalorder %s4007_s7, %s3695_s30  ;;  %p3699_p7 = scmp.lt.u32.totalorder %s3695_s30, %s4007_s7 }
 0x1cf   :  { %p3701_p8 = pnand %p3699_p7, %p3696_p6 }
 0x1d1   :  { %3704 = shalt.err (!%p3701_p8)
}
 0x1d2   :  { %2783 = dma.vmem_to_hbm [thread:$0]  %s2781_s27, 192, %s4007_s7, [#allocation14]   ;;  %v3960_v24 = vsub.s32 2, %v3899_v51  ;;  %v3752_v31 = vmov 1966171168   ;;  %v3963_v15 = vsub.s32 3, %v3899_v51  ;;  %v2565_v12 = vpop.permute.xlu0 %2564 }
 0x1d3   :  { %v2591_v32 = vunpack.c.l.s4 %v3752_v31  ;;  %v679_v47 = vsub.s32 4, %v3899_v51  ;;  %v683_v48 = vsub.s32 5, %v3899_v51  ;;  %s3753_s7 = smov [#allocation12]  }
 0x1d4   :  { %v672_v33 = vrot.slane %v3919_v5, %v3960_v24  ;;  %v676_v35 = vrot.slane %v3919_v5, %v3963_v15  ;;  %s2757_s12 = sshll.u32 %s3753_s7, 4  ;;  %s2758_s12 = int_to_ptr.vmem [resolvable:$true] %s2757_s12 }
 0x1d5   :  { %v2592_v34 = vunpack.c.0.s8 %v2591_v32  ;;  %v680_v49 = vrot.slane %v3919_v5, %v679_v47  ;;  %v684_v50 = vrot.slane %v3919_v5, %v683_v48  ;;  %s3705_s4 = scalar_lea.vmem %s2758_s12, 3072  ;;  %p3710_p10 = scmp.lt.s32.totalorder %s2758_s12, %s2758_s12 }
 0x1d6   :  { %v2569_v4 = vpop.permute.xlu0 %2568  ;;  %p3706_p9 = scmp.ne.s32.totalorder %s2758_s12, %s3705_s4  ;;  %p3711_p11 = scmp.lt.s32.totalorder %s3705_s4, %s3705_s4 }
 0x1d7   :  { %v2595_v39 = vsub.s32 %v2592_v34, %v3899_v51  ;;  %v2576_v51 = vpop.permute.xlu1 %2575 }
 0x1d8   :  { %p3712_p12 = por %p3711_p11, %p3710_p10 }
 0x1d9   :  { %v2596_v44 = vrot.slane %v2587_v10, %v2595_v39 }
 0x1da   :  { %p3713_p13 = pnand %p3712_p12, %p3706_p9 }
 0x1db   :  { %v2580_v29 = vpop.permute.xlu1 %2579 }
 0x22b   :  { %v2412_v36 = vpop.f32.mrb[4].mxu1 }
 0x22c   :  { %v3092_v37 = vadd.f32 %v2412_v36, %v672_v33  ;;  %v2414_v38 = vpop.f32.mrb[5].mxu1 }
 0x22d   :  { %v3093_v40 = vadd.f32 %v2414_v38, %v676_v35  ;;  %v2416_v28 = vpop.f32.mrb[6].mxu1 }
 0x22e   :  { %v2417_v41 = vpop.f32.mrb[7].mxu1 }
 0x22f   :  { %v2588_v42 = vcombine.low %v3092_v37, %v3093_v40 }
 0x231   :  { %v2603_v43 = vrot.slane %v2588_v42, %v2595_v39 }
 0x233   :  { %v2611_v45 = vcombine.low %v2596_v44, %v2603_v43  ;;  %v2612_v46 = vcombine.high %v2596_v44, %v2603_v43 }
 0x235   :  { %v2620_v10 = vrot.slane %v2611_v45, %v2595_v39  ;;  %v2627_v61 = vrot.slane %v2612_v46, %v2595_v39 }
 0x26d   :  { %v2535_v52 = vpop.f32.mrb[4].mxu0 }
 0x26e   :  { %v3094_v53 = vadd.f32 %v2535_v52, %v680_v49  ;;  %v2537_v54 = vpop.f32.mrb[5].mxu0 }
 0x26f   :  { %v3095_v55 = vadd.f32 %v2537_v54, %v684_v50  ;;  %v2539_v56 = vpop.f32.mrb[6].mxu0 }
 0x270   :  { %v2540_v57 = vpop.f32.mrb[7].mxu0 }
 0x271   :  { %v2589_v58 = vcombine.low %v3094_v53, %v3095_v55 }
 0x273   :  { %v2610_v16 = vrot.slane %v2589_v58, %v2595_v39 }
 0x275   :  { %v2613_v59 = vcombine.high %v2610_v16, %v2610_v16  ;;  %v2634_v60 = vrot.slane %v2610_v16, %v2595_v39 }
 0x277   :  { %v2641_v62 = vrot.slane %v2613_v59, %v2595_v39  ;;  %v2642_v63 = vcombine.low %v2620_v10, %v2634_v60 }
 0x279   :  { %v2643_v2 = vcombine.low %v2627_v61, %v2641_v62  ;;  %v2647_v5 = vrot.slane %v2642_v63, %v3904_v0  ;;  %v2651_v3 = vrot.slane %v2642_v63, %v3907_v1  ;;  %v2655_v6 = vrot.slane %v2642_v63, %v3960_v24 }
 0x27a   :  { %v2659_v7 = vrot.slane %v2642_v63, %v3963_v15  ;;  %v2663_v8 = vrot.slane %v2642_v63, %v679_v47  ;;  %v2667_v9 = vrot.slane %v2642_v63, %v683_v48 }
 0x27b   :  { %v2704_v11 = vmul.f32 %v2647_v5, %v2565_v12  ;;  %v2705_v13 = vmul.f32 %v2651_v3, %v2565_v12  ;;  %v2706_v17 = vmul.f32 %v2655_v6, %v2565_v12  ;;  %v2710_v18 = vmul.f32 %v2647_v5, %v2569_v4 }
 0x27c   :  { %v2707_v19 = vmul.f32 %v2659_v7, %v2565_v12  ;;  %v2708_v20 = vmul.f32 %v2663_v8, %v2565_v12  ;;  %v2709_v22 = vmul.f32 %v2667_v9, %v2565_v12  ;;  %v2711_v23 = vmul.f32 %v2651_v3, %v2569_v4 }
 0x27d   :  { %v2712_v25 = vmul.f32 %v2655_v6, %v2569_v4  ;;  %v2713_v21 = vmul.f32 %v2659_v7, %v2569_v4  ;;  %v2714_v26 = vmul.f32 %v2663_v8, %v2569_v4  ;;  %v2715_v27 = vmul.f32 %v2667_v9, %v2569_v4  ;;  %2728 = vst [vmem:[#allocation12] sm:$0xff] %v2704_v11 }
 0x27e   :  { %2729 = vst [vmem:[#allocation12 + $0x8] sm:$0xff] %v2705_v13  ;;  %2730 = vst [vmem:[#allocation12 + $0x10] sm:$0xff] %v2706_v17  ;;  %v2671_v14 = vrot.slane %v2643_v2, %v3904_v0  ;;  %v2675_v30 = vrot.slane %v2643_v2, %v3907_v1  ;;  %v2679_v31 = vrot.slane %v2643_v2, %v3960_v24 }
 0x27f   :  { %2734 = vst [vmem:[#allocation12 + $0x30] sm:$0xff] %v2710_v18  ;;  %2731 = vst [vmem:[#allocation12 + $0x18] sm:$0xff] %v2707_v19  ;;  %v2683_v32 = vrot.slane %v2643_v2, %v3963_v15  ;;  %v2687_v33 = vrot.slane %v2643_v2, %v679_v47  ;;  %v2691_v34 = vrot.slane %v2643_v2, %v683_v48 }
 0x280   :  { %2732 = vst [vmem:[#allocation12 + $0x20] sm:$0xff] %v2708_v20  ;;  %2733 = vst [vmem:[#allocation12 + $0x28] sm:$0xff] %v2709_v22  ;;  %v2716_v35 = vmul.f32 %v2671_v14, %v2576_v51  ;;  %v2717_v36 = vmul.f32 %v2675_v30, %v2576_v51  ;;  %v2718_v37 = vmul.f32 %v2679_v31, %v2576_v51 }
 0x281   :  { %2735 = vst [vmem:[#allocation12 + $0x38] sm:$0xff] %v2711_v23  ;;  %2736 = vst [vmem:[#allocation12 + $0x40] sm:$0xff] %v2712_v25  ;;  %v2719_v38 = vmul.f32 %v2683_v32, %v2576_v51  ;;  %v2720_v39 = vmul.f32 %v2687_v33, %v2576_v51  ;;  %v2721_v0 = vmul.f32 %v2691_v34, %v2576_v51 }
 0x282   :  { %2737 = vst [vmem:[#allocation12 + $0x48] sm:$0xff] %v2713_v21  ;;  %2738 = vst [vmem:[#allocation12 + $0x50] sm:$0xff] %v2714_v26  ;;  %v2722_v40 = vmul.f32 %v2671_v14, %v2580_v29  ;;  %v2723_v1 = vmul.f32 %v2675_v30, %v2580_v29  ;;  %v2724_v28 = vmul.f32 %v2679_v31, %v2580_v29 }
 0x283   :  { %2739 = vst [vmem:[#allocation12 + $0x58] sm:$0xff] %v2715_v27  ;;  %v2725_v24 = vmul.f32 %v2683_v32, %v2580_v29  ;;  %v2726_v41 = vmul.f32 %v2687_v33, %v2580_v29  ;;  %v2727_v15 = vmul.f32 %v2691_v34, %v2580_v29  ;;  %2740 = vst [vmem:[#allocation12 + $0x60] sm:$0xff] %v2716_v35 }
 0x284   :  { %2741 = vst [vmem:[#allocation12 + $0x68] sm:$0xff] %v2717_v36  ;;  %2742 = vst [vmem:[#allocation12 + $0x70] sm:$0xff] %v2718_v37 }
 0x285   :  { %2743 = vst [vmem:[#allocation12 + $0x78] sm:$0xff] %v2719_v38  ;;  %2744 = vst [vmem:[#allocation12 + $0x80] sm:$0xff] %v2720_v39 }
 0x286   :  { %2745 = vst [vmem:[#allocation12 + $0x88] sm:$0xff] %v2721_v0  ;;  %2746 = vst [vmem:[#allocation12 + $0x90] sm:$0xff] %v2722_v40 }
 0x287   :  { %2747 = vst [vmem:[#allocation12 + $0x98] sm:$0xff] %v2723_v1  ;;  %2748 = vst [vmem:[#allocation12 + $0xa0] sm:$0xff] %v2724_v28 }
 0x288   :  { %2749 = vst [vmem:[#allocation12 + $0xa8] sm:$0xff] %v2725_v24  ;;  %2750 = vst [vmem:[#allocation12 + $0xb0] sm:$0xff] %v2726_v41 }
 0x289   :  { %2751 = vst [vmem:[#allocation12 + $0xb8] sm:$0xff] %v2727_v15 }
 0x28a   :  { %3716 = shalt.err (!%p3713_p13)
}
 0x28b   :  { %s3717_s16 = scalar_lea.hbm %s4005_s5, 3072 }
 0x28c   :  { %p3718_p0 = scmp.ne.s32.totalorder %s4005_s5, %s3717_s16  ;;  %p3721_p1 = scmp.lt.u32.totalorder %s3717_s16, %s4005_s5 }
 0x28e   :  { %p3723_p2 = pnand %p3721_p1, %p3718_p0 }
 0x290   :  { %3726 = shalt.err (!%p3723_p2)
}
 0x291   :  { %2763 = dma.vmem_to_hbm [thread:$0]  %s2758_s12, 3072, %s4005_s5, [#allocation6], %s3742_s22, %s3742_s22, %s3743_s23  }
 0x292   :  { %3735 = dma.done.wait [#allocation6], 3072  }
 0x293   :  { %3736 = vsyncadd [#allocation6], 4294964224 }
 0x294   :  { %3737 = dma.done.wait [#allocation14], 224  }
 0x295   :  { %3738 = vsyncadd [#allocation14], 4294967072 }
 0x296   :  { %2793 = vsyncpa [#allocation5], 1 }
 0x297   :  { %2794 = vsyncpa [#allocation8], 1 }
 0x298   :  { %2795 = vsyncpa [#allocation11], 1 }
 0x299   :  { %2796 = vsyncpa [#allocation6], 1 }
 0x29a   :  { %2797 = vsyncpa [#allocation14], 1 }

</bundles_post_ra>
